<compile_context>
chip_gen: v6e
topology: v6e:2x2x1
jax: 0.10.0
libtpu: 0.0.40
codegen_flags: <defaults>
</compile_context>

<pallas_src>
import functools

import jax
import jax.numpy as jnp
import numpy as np
from jax import lax
from jax.experimental import pallas as pl
from jax.experimental.pallas import tpu as pltpu

# Small, TPU-friendly shapes consistent with the module (n_embed plays the
# role of the global `n_embed`; head_size = n_embed // n_head).
N_EMBED = 128
N_HEAD = 4
HEAD_SIZE = N_EMBED // N_HEAD
SEQ_LEN = 16
BATCH = 2
LN_EPS = 1e-5


def _layernorm(x, g, b):
    mu = jnp.mean(x, axis=-1, keepdims=True)
    var = jnp.mean((x - mu) ** 2, axis=-1, keepdims=True)
    return (x - mu) * lax.rsqrt(var + LN_EPS) * g + b


def block_kernel(
    x_ref,
    ln1_g_ref, ln1_b_ref,
    wqkv_ref,
    wproj_ref, bproj_ref,
    ln2_g_ref, ln2_b_ref,
    w1_ref, b1_ref, w2_ref, b2_ref,
    out_ref,
    *, batch, seq_len, n_head, head_size,
):
    f32 = jnp.float32
    bf16 = jnp.bfloat16

    x = x_ref[...]                            # (B*T, C) f32
    BT, C = x.shape
    T = seq_len

    # ---- x = x + SA(LN1(x)) ----
    xn = _layernorm(x, ln1_g_ref[...], ln1_b_ref[...])

    # Fused QKV projection: one (B*T, C) x (C, 3C) MXU op, bf16 / f32 acc.
    qkv = jnp.dot(xn.astype(bf16), wqkv_ref[...],
                  preferred_element_type=f32)                     # (B*T, 3C)

    # NOTE: the PyTorch code scales by C**-0.5 where C is the *embedding* dim
    # (not head_size); reproduce that exactly, folded into q once.
    scale = float(C) ** (-0.5)
    q = qkv[:, :C] * scale                     # (B*T, C) f32, 128-lane-aligned slices
    k = qkv[:, C:2 * C]
    v = qkv[:, 2 * C:]

    rows = lax.broadcasted_iota(jnp.int32, (T, T), 0)
    cols = lax.broadcasted_iota(jnp.int32, (T, T), 1)
    causal = (cols <= rows)[None]              # (1, T, T), broadcast over heads
    neg_big = jnp.float32(-1e30)               # finite mask value (no inf arithmetic)

    wproj3 = wproj_ref[...]                    # (H, head_size, C) bf16

    def heads(z, b):
        # (B*T, C) -> (H, T, head_size) for batch element b.
        zb = z[b * T:(b + 1) * T, :]
        return jnp.stack(
            [zb[:, h * head_size:(h + 1) * head_size] for h in range(n_head)],
            axis=0)

    sa_rows = []
    for b in range(batch):                     # B is tiny and static: unrolled
        qh = heads(q, b).astype(bf16)          # (H, T, hs)
        kh = heads(k, b).astype(bf16)
        vh = heads(v, b).astype(bf16)

        # scores for all heads in one batched dot_general (no explicit k.T).
        s = jnp.einsum('hqd,hkd->hqk', qh, kh,
                       preferred_element_type=f32)                # (H, T, T)
        s = jnp.where(causal, s, neg_big)
        s = s - jnp.max(s, axis=-1, keepdims=True)
        p = jnp.exp(s)
        p = p * pl.reciprocal(jnp.sum(p, axis=-1, keepdims=True), approx=True)

        o = jnp.einsum('hqk,hkd->hqd', p.astype(bf16), vh,
                       preferred_element_type=f32)                # (H, T, hs)

        # Output projection folded per head, then reduced over heads, so no
        # lane-axis concatenate is needed.
        sa_b = jnp.einsum('hqd,hdc->hqc', o.astype(bf16), wproj3,
                          preferred_element_type=f32).sum(axis=0)  # (T, C)
        sa_rows.append(sa_b)

    sa = jnp.concatenate(sa_rows, axis=0)      # (B*T, C)
    x1 = x + sa + bproj_ref[...]

    # ---- x = x + FFN(LN2(x)) ----
    xn2 = _layernorm(x1, ln2_g_ref[...], ln2_b_ref[...])
    h1 = jnp.dot(xn2.astype(bf16), w1_ref[...],
                 preferred_element_type=f32) + b1_ref[...]
    h1 = jnp.maximum(h1, 0.0)
    ff = jnp.dot(h1.astype(bf16), w2_ref[...],
                 preferred_element_type=f32) + b2_ref[...]

    out_ref[...] = (x1 + ff).astype(out_ref.dtype)


def init_params(key, n_embed):
    ks = jax.random.split(key, 10)
    hidden = 4 * n_embed
    p = {
        "ln1_g": jnp.ones((1, n_embed), jnp.float32),
        "ln1_b": jnp.zeros((1, n_embed), jnp.float32),
        # q/k/v/proj weights stored as (in, out)
        "wq": 0.02 * jax.random.normal(ks[0], (n_embed, n_embed), jnp.float32),
        "wk": 0.02 * jax.random.normal(ks[1], (n_embed, n_embed), jnp.float32),
        "wv": 0.02 * jax.random.normal(ks[2], (n_embed, n_embed), jnp.float32),
        "wproj": 0.02 * jax.random.normal(ks[3], (n_embed, n_embed), jnp.float32),
        "bproj": 0.02 * jax.random.normal(ks[4], (1, n_embed), jnp.float32),
        "ln2_g": jnp.ones((1, n_embed), jnp.float32),
        "ln2_b": jnp.zeros((1, n_embed), jnp.float32),
        "w1": 0.02 * jax.random.normal(ks[5], (n_embed, hidden), jnp.float32),
        "b1": 0.02 * jax.random.normal(ks[6], (1, hidden), jnp.float32),
        "w2": 0.02 * jax.random.normal(ks[7], (hidden, n_embed), jnp.float32),
        "b2": 0.02 * jax.random.normal(ks[8], (1, n_embed), jnp.float32),
    }
    return p


def block_forward(x, p):
    B, T, C = x.shape
    H, hs = N_HEAD, HEAD_SIZE
    bf16 = jnp.bfloat16

    # Fuse Q/K/V weights once in the wrapper; matmul weights go in as bf16
    # (f32 accumulation inside the kernel). Biases / LN params stay f32.
    wqkv = jnp.concatenate([p["wq"], p["wk"], p["wv"]], axis=1).astype(bf16)  # (C, 3C)
    wproj3 = p["wproj"].reshape(H, hs, C).astype(bf16)                        # (H, hs, C)
    w1 = p["w1"].astype(bf16)
    w2 = p["w2"].astype(bf16)

    # Flatten batch into the row (sublane) axis: one kernel invocation covers
    # the whole batch.  T is a multiple of 8, so this is layout-preserving.
    x2 = x.reshape(B * T, C)

    kernel = functools.partial(block_kernel, batch=B, seq_len=T,
                               n_head=H, head_size=hs)

    vmem = pl.BlockSpec(memory_space=pltpu.MemorySpace.VMEM)

    out = pl.pallas_call(
        kernel,
        out_shape=jax.ShapeDtypeStruct((B * T, C), x.dtype),
        in_specs=[vmem] * 12,
        out_specs=vmem,
    )(
        x2,
        p["ln1_g"], p["ln1_b"],
        wqkv,
        wproj3, p["bproj"],
        p["ln2_g"], p["ln2_b"],
        w1, p["b1"], w2, p["b2"],
    )
    return out.reshape(B, T, C)


def block_reference(x, p):
    """Pure-JAX f32 reference mirroring the PyTorch Block (eval mode)."""
    B, T, C = x.shape

    def ln(z, g, b):
        mu = jnp.mean(z, axis=-1, keepdims=True)
        var = jnp.mean((z - mu) ** 2, axis=-1, keepdims=True)
        return (z - mu) / jnp.sqrt(var + LN_EPS) * g + b

    xn = ln(x, p["ln1_g"], p["ln1_b"])
    q = xn @ p["wq"]
    k = xn @ p["wk"]
    v = xn @ p["wv"]
    qh = q.reshape(B, T, N_HEAD, HEAD_SIZE).transpose(0, 2, 1, 3)
    kh = k.reshape(B, T, N_HEAD, HEAD_SIZE).transpose(0, 2, 1, 3)
    vh = v.reshape(B, T, N_HEAD, HEAD_SIZE).transpose(0, 2, 1, 3)
    s = jnp.einsum("bhqd,bhkd->bhqk", qh, kh) * (C ** -0.5)
    mask = jnp.tril(jnp.ones((T, T), bool))
    s = jnp.where(mask, s, -jnp.inf)
    w = jax.nn.softmax(s, axis=-1)
    att = jnp.einsum("bhqk,bhkd->bhqd", w, vh).transpose(0, 2, 1, 3).reshape(B, T, C)
    x1 = x + att @ p["wproj"] + p["bproj"]
    xn2 = ln(x1, p["ln2_g"], p["ln2_b"])
    ff = jnp.maximum(xn2 @ p["w1"] + p["b1"], 0.0) @ p["w2"] + p["b2"]
    return x1 + ff


if __name__ == "__main__":
    key = jax.random.PRNGKey(0)
    k_x, k_p = jax.random.split(key)
    x = jax.random.normal(k_x, (BATCH, SEQ_LEN, N_EMBED), jnp.float32)
    params = init_params(k_p, N_EMBED)

    out = block_forward(x, params)
    out = jax.block_until_ready(out)

    ref = block_reference(x, params)
    np.testing.assert_allclose(np.asarray(out), np.asarray(ref), rtol=2e-2, atol=2e-2)

    print("KERNEL_OK")
</pallas_src>

<mosaic_0001>
module attributes {stable_mosaic.version = 11 : i64} {
  func.func @block_kernel(%arg0: memref<32x128xf32, #tpu.memory_space<vmem>>, %arg1: memref<1x128xf32, #tpu.memory_space<vmem>>, %arg2: memref<1x128xf32, #tpu.memory_space<vmem>>, %arg3: memref<128x384xbf16, #tpu.memory_space<vmem>>, %arg4: memref<4x32x128xbf16, #tpu.memory_space<vmem>>, %arg5: memref<1x128xf32, #tpu.memory_space<vmem>>, %arg6: memref<1x128xf32, #tpu.memory_space<vmem>>, %arg7: memref<1x128xf32, #tpu.memory_space<vmem>>, %arg8: memref<128x512xbf16, #tpu.memory_space<vmem>>, %arg9: memref<1x512xf32, #tpu.memory_space<vmem>>, %arg10: memref<512x128xbf16, #tpu.memory_space<vmem>>, %arg11: memref<1x128xf32, #tpu.memory_space<vmem>>, %arg12: memref<32x128xf32, #tpu.memory_space<vmem>>) attributes {dimension_semantics = [], scalar_prefetch = 0 : i64, scratch_operands = 0 : i64, tpu.core_type = #tpu.core_type<tc>} {
    %c0 = arith.constant 0 : index
    %c0_0 = arith.constant 0 : index
    %0 = vector.load %arg0[%c0, %c0_0] : memref<32x128xf32, #tpu.memory_space<vmem>>, vector<32x128xf32>
    %c0_1 = arith.constant 0 : index
    %c0_2 = arith.constant 0 : index
    %1 = vector.load %arg1[%c0_1, %c0_2] : memref<1x128xf32, #tpu.memory_space<vmem>>, vector<1x128xf32>
    %c0_3 = arith.constant 0 : index
    %c0_4 = arith.constant 0 : index
    %2 = vector.load %arg2[%c0_3, %c0_4] : memref<1x128xf32, #tpu.memory_space<vmem>>, vector<1x128xf32>
    %cst = arith.constant dense<0.000000e+00> : vector<32xf32>
    %3 = vector.multi_reduction <add>, %0, %cst [1] : vector<32x128xf32> to vector<32xf32>
    %4 = vector.shape_cast %3 : vector<32xf32> to vector<32x1xf32>
    %cst_5 = arith.constant 1.280000e+02 : f32
    %5 = vector.broadcast %cst_5 : f32 to vector<32x1xf32>
    %6 = arith.divf %4, %5 : vector<32x1xf32>
    %7 = vector.broadcast %6 : vector<32x1xf32> to vector<32x128xf32>
    %8 = arith.subf %0, %7 : vector<32x128xf32>
    %9 = arith.mulf %8, %8 : vector<32x128xf32>
    %cst_6 = arith.constant dense<0.000000e+00> : vector<32xf32>
    %10 = vector.multi_reduction <add>, %9, %cst_6 [1] : vector<32x128xf32> to vector<32xf32>
    %11 = vector.shape_cast %10 : vector<32xf32> to vector<32x1xf32>
    %cst_7 = arith.constant 1.280000e+02 : f32
    %12 = vector.broadcast %cst_7 : f32 to vector<32x1xf32>
    %13 = arith.divf %11, %12 : vector<32x1xf32>
    %14 = vector.broadcast %6 : vector<32x1xf32> to vector<32x128xf32>
    %15 = arith.subf %0, %14 : vector<32x128xf32>
    %cst_8 = arith.constant 9.99999974E-6 : f32
    %16 = vector.broadcast %cst_8 : f32 to vector<32x1xf32>
    %17 = arith.addf %13, %16 : vector<32x1xf32>
    %18 = math.rsqrt %17 : vector<32x1xf32>
    %19 = vector.broadcast %18 : vector<32x1xf32> to vector<32x128xf32>
    %20 = arith.mulf %15, %19 : vector<32x128xf32>
    %21 = vector.broadcast %1 : vector<1x128xf32> to vector<32x128xf32>
    %22 = arith.mulf %20, %21 : vector<32x128xf32>
    %23 = vector.broadcast %2 : vector<1x128xf32> to vector<32x128xf32>
    %24 = arith.addf %22, %23 : vector<32x128xf32>
    %25 = arith.truncf %24 : vector<32x128xf32> to vector<32x128xbf16>
    %c0_9 = arith.constant 0 : index
    %c0_10 = arith.constant 0 : index
    %26 = vector.load %arg3[%c0_9, %c0_10] : memref<128x384xbf16, #tpu.memory_space<vmem>>, vector<128x384xbf16>
    %cst_11 = arith.constant dense<0.000000e+00> : vector<32x384xf32>
    %27 = tpu.matmul %25, %26, %cst_11 {dimension_numbers = #tpu.dot_dimension_numbers<[1], [0], [0], [1], [0, 0, 1, 1], [], []>} : vector<32x128xbf16>, vector<128x384xbf16>, vector<32x384xf32> -> vector<32x384xf32>
    %28 = vector.extract_strided_slice %27 {offsets = [0, 0], sizes = [32, 128], strides = [1, 1]} : vector<32x384xf32> to vector<32x128xf32>
    %cst_12 = arith.constant 0.0883883461 : f32
    %29 = vector.broadcast %cst_12 : f32 to vector<32x128xf32>
    %30 = arith.mulf %28, %29 : vector<32x128xf32>
    %31 = vector.extract_strided_slice %27 {offsets = [0, 128], sizes = [32, 128], strides = [1, 1]} : vector<32x384xf32> to vector<32x128xf32>
    %32 = vector.extract_strided_slice %27 {offsets = [0, 256], sizes = [32, 128], strides = [1, 1]} : vector<32x384xf32> to vector<32x128xf32>
    %33 = tpu.iota {dimensions = array<i32: 0>} : vector<16x16xi32>
    %34 = tpu.iota {dimensions = array<i32: 1>} : vector<16x16xi32>
    %35 = arith.cmpi sle, %34, %33 : vector<16x16xi32>
    %36 = vector.shape_cast %35 : vector<16x16xi1> to vector<1x16x16xi1>
    %c0_13 = arith.constant 0 : index
    %c0_14 = arith.constant 0 : index
    %c0_15 = arith.constant 0 : index
    %37 = vector.load %arg4[%c0_13, %c0_14, %c0_15] : memref<4x32x128xbf16, #tpu.memory_space<vmem>>, vector<4x32x128xbf16>
    %38 = vector.extract_strided_slice %30 {offsets = [0, 0], sizes = [16, 128], strides = [1, 1]} : vector<32x128xf32> to vector<16x128xf32>
    %39 = vector.extract_strided_slice %38 {offsets = [0, 0], sizes = [16, 32], strides = [1, 1]} : vector<16x128xf32> to vector<16x32xf32>
    %40 = vector.extract_strided_slice %38 {offsets = [0, 32], sizes = [16, 32], strides = [1, 1]} : vector<16x128xf32> to vector<16x32xf32>
    %41 = vector.extract_strided_slice %38 {offsets = [0, 64], sizes = [16, 32], strides = [1, 1]} : vector<16x128xf32> to vector<16x32xf32>
    %42 = vector.extract_strided_slice %38 {offsets = [0, 96], sizes = [16, 32], strides = [1, 1]} : vector<16x128xf32> to vector<16x32xf32>
    %43 = vector.shape_cast %39 : vector<16x32xf32> to vector<1x16x32xf32>
    %44 = vector.shape_cast %40 : vector<16x32xf32> to vector<1x16x32xf32>
    %45 = vector.shape_cast %41 : vector<16x32xf32> to vector<1x16x32xf32>
    %46 = vector.shape_cast %42 : vector<16x32xf32> to vector<1x16x32xf32>
    %47 = tpu.concatenate %43, %44, %45, %46 in 0 : vector<1x16x32xf32>, vector<1x16x32xf32>, vector<1x16x32xf32>, vector<1x16x32xf32> -> vector<4x16x32xf32>
    %48 = arith.truncf %47 : vector<4x16x32xf32> to vector<4x16x32xbf16>
    %49 = vector.extract_strided_slice %31 {offsets = [0, 0], sizes = [16, 128], strides = [1, 1]} : vector<32x128xf32> to vector<16x128xf32>
    %50 = vector.extract_strided_slice %49 {offsets = [0, 0], sizes = [16, 32], strides = [1, 1]} : vector<16x128xf32> to vector<16x32xf32>
    %51 = vector.extract_strided_slice %49 {offsets = [0, 32], sizes = [16, 32], strides = [1, 1]} : vector<16x128xf32> to vector<16x32xf32>
    %52 = vector.extract_strided_slice %49 {offsets = [0, 64], sizes = [16, 32], strides = [1, 1]} : vector<16x128xf32> to vector<16x32xf32>
    %53 = vector.extract_strided_slice %49 {offsets = [0, 96], sizes = [16, 32], strides = [1, 1]} : vector<16x128xf32> to vector<16x32xf32>
    %54 = vector.shape_cast %50 : vector<16x32xf32> to vector<1x16x32xf32>
    %55 = vector.shape_cast %51 : vector<16x32xf32> to vector<1x16x32xf32>
    %56 = vector.shape_cast %52 : vector<16x32xf32> to vector<1x16x32xf32>
    %57 = vector.shape_cast %53 : vector<16x32xf32> to vector<1x16x32xf32>
    %58 = tpu.concatenate %54, %55, %56, %57 in 0 : vector<1x16x32xf32>, vector<1x16x32xf32>, vector<1x16x32xf32>, vector<1x16x32xf32> -> vector<4x16x32xf32>
    %59 = arith.truncf %58 : vector<4x16x32xf32> to vector<4x16x32xbf16>
    %60 = vector.extract_strided_slice %32 {offsets = [0, 0], sizes = [16, 128], strides = [1, 1]} : vector<32x128xf32> to vector<16x128xf32>
    %61 = vector.extract_strided_slice %60 {offsets = [0, 0], sizes = [16, 32], strides = [1, 1]} : vector<16x128xf32> to vector<16x32xf32>
    %62 = vector.extract_strided_slice %60 {offsets = [0, 32], sizes = [16, 32], strides = [1, 1]} : vector<16x128xf32> to vector<16x32xf32>
    %63 = vector.extract_strided_slice %60 {offsets = [0, 64], sizes = [16, 32], strides = [1, 1]} : vector<16x128xf32> to vector<16x32xf32>
    %64 = vector.extract_strided_slice %60 {offsets = [0, 96], sizes = [16, 32], strides = [1, 1]} : vector<16x128xf32> to vector<16x32xf32>
    %65 = vector.shape_cast %61 : vector<16x32xf32> to vector<1x16x32xf32>
    %66 = vector.shape_cast %62 : vector<16x32xf32> to vector<1x16x32xf32>
    %67 = vector.shape_cast %63 : vector<16x32xf32> to vector<1x16x32xf32>
    %68 = vector.shape_cast %64 : vector<16x32xf32> to vector<1x16x32xf32>
    %69 = tpu.concatenate %65, %66, %67, %68 in 0 : vector<1x16x32xf32>, vector<1x16x32xf32>, vector<1x16x32xf32>, vector<1x16x32xf32> -> vector<4x16x32xf32>
    %70 = arith.truncf %69 : vector<4x16x32xf32> to vector<4x16x32xbf16>
    "tpu.trace_start"() <{level = 10 : i32, message = "hqd,hkd->hqk"}> : () -> ()
    %cst_16 = arith.constant dense<0.000000e+00> : vector<4x16x16xf32>
    %71 = tpu.matmul %48, %59, %cst_16 {dimension_numbers = #tpu.dot_dimension_numbers<[2], [2], [1], [1], [0, 0, 0, 1, 1, 1], [0], [0]>} : vector<4x16x32xbf16>, vector<4x16x32xbf16>, vector<4x16x16xf32> -> vector<4x16x16xf32>
    %cst_17 = arith.constant -1.000000e+30 : f32
    "tpu.trace_stop"() : () -> ()
    %72 = vector.shape_cast %36 : vector<1x16x16xi1> to vector<1x16x16xi1>
    %73 = vector.broadcast %72 : vector<1x16x16xi1> to vector<4x16x16xi1>
    %74 = vector.broadcast %cst_17 : f32 to vector<4x16x16xf32>
    %75 = arith.select %73, %71, %74 : vector<4x16x16xi1>, vector<4x16x16xf32>
    %cst_18 = arith.constant dense<0xFF800000> : vector<4x16xf32>
    %76 = vector.multi_reduction <maximumf>, %75, %cst_18 [2] : vector<4x16x16xf32> to vector<4x16xf32>
    %77 = vector.shape_cast %76 : vector<4x16xf32> to vector<4x16x1xf32>
    %78 = vector.broadcast %77 : vector<4x16x1xf32> to vector<4x16x16xf32>
    %79 = arith.subf %75, %78 : vector<4x16x16xf32>
    %80 = math.exp %79 : vector<4x16x16xf32>
    %cst_19 = arith.constant dense<0.000000e+00> : vector<4x16xf32>
    %81 = vector.multi_reduction <add>, %80, %cst_19 [2] : vector<4x16x16xf32> to vector<4x16xf32>
    %82 = vector.shape_cast %81 : vector<4x16xf32> to vector<4x16x1xf32>
    %83 = tpu.reciprocal %82 {approx = true} : vector<4x16x1xf32> -> vector<4x16x1xf32>
    %84 = vector.broadcast %83 : vector<4x16x1xf32> to vector<4x16x16xf32>
    %85 = arith.mulf %80, %84 : vector<4x16x16xf32>
    %86 = arith.truncf %85 : vector<4x16x16xf32> to vector<4x16x16xbf16>
    "tpu.trace_start"() <{level = 10 : i32, message = "hqk,hkd->hqd"}> : () -> ()
    %cst_20 = arith.constant dense<0.000000e+00> : vector<4x16x32xf32>
    %87 = tpu.matmul %86, %70, %cst_20 {dimension_numbers = #tpu.dot_dimension_numbers<[2], [1], [1], [2], [0, 0, 0, 1, 1, 2], [0], [0]>} : vector<4x16x16xbf16>, vector<4x16x32xbf16>, vector<4x16x32xf32> -> vector<4x16x32xf32>
    "tpu.trace_stop"() : () -> ()
    %88 = arith.truncf %87 : vector<4x16x32xf32> to vector<4x16x32xbf16>
    "tpu.trace_start"() <{level = 10 : i32, message = "hqd,hdc->hqc"}> : () -> ()
    %cst_21 = arith.constant dense<0.000000e+00> : vector<4x16x128xf32>
    %89 = tpu.matmul %88, %37, %cst_21 {dimension_numbers = #tpu.dot_dimension_numbers<[2], [1], [1], [2], [0, 0, 0, 1, 1, 2], [0], [0]>} : vector<4x16x32xbf16>, vector<4x32x128xbf16>, vector<4x16x128xf32> -> vector<4x16x128xf32>
    "tpu.trace_stop"() : () -> ()
    %cst_22 = arith.constant dense<0.000000e+00> : vector<16x128xf32>
    %90 = vector.multi_reduction <add>, %89, %cst_22 [0] : vector<4x16x128xf32> to vector<16x128xf32>
    %91 = vector.extract_strided_slice %30 {offsets = [16, 0], sizes = [16, 128], strides = [1, 1]} : vector<32x128xf32> to vector<16x128xf32>
    %92 = vector.extract_strided_slice %91 {offsets = [0, 0], sizes = [16, 32], strides = [1, 1]} : vector<16x128xf32> to vector<16x32xf32>
    %93 = vector.extract_strided_slice %91 {offsets = [0, 32], sizes = [16, 32], strides = [1, 1]} : vector<16x128xf32> to vector<16x32xf32>
    %94 = vector.extract_strided_slice %91 {offsets = [0, 64], sizes = [16, 32], strides = [1, 1]} : vector<16x128xf32> to vector<16x32xf32>
    %95 = vector.extract_strided_slice %91 {offsets = [0, 96], sizes = [16, 32], strides = [1, 1]} : vector<16x128xf32> to vector<16x32xf32>
    %96 = vector.shape_cast %92 : vector<16x32xf32> to vector<1x16x32xf32>
    %97 = vector.shape_cast %93 : vector<16x32xf32> to vector<1x16x32xf32>
    %98 = vector.shape_cast %94 : vector<16x32xf32> to vector<1x16x32xf32>
    %99 = vector.shape_cast %95 : vector<16x32xf32> to vector<1x16x32xf32>
    %100 = tpu.concatenate %96, %97, %98, %99 in 0 : vector<1x16x32xf32>, vector<1x16x32xf32>, vector<1x16x32xf32>, vector<1x16x32xf32> -> vector<4x16x32xf32>
    %101 = arith.truncf %100 : vector<4x16x32xf32> to vector<4x16x32xbf16>
    %102 = vector.extract_strided_slice %31 {offsets = [16, 0], sizes = [16, 128], strides = [1, 1]} : vector<32x128xf32> to vector<16x128xf32>
    %103 = vector.extract_strided_slice %102 {offsets = [0, 0], sizes = [16, 32], strides = [1, 1]} : vector<16x128xf32> to vector<16x32xf32>
    %104 = vector.extract_strided_slice %102 {offsets = [0, 32], sizes = [16, 32], strides = [1, 1]} : vector<16x128xf32> to vector<16x32xf32>
    %105 = vector.extract_strided_slice %102 {offsets = [0, 64], sizes = [16, 32], strides = [1, 1]} : vector<16x128xf32> to vector<16x32xf32>
    %106 = vector.extract_strided_slice %102 {offsets = [0, 96], sizes = [16, 32], strides = [1, 1]} : vector<16x128xf32> to vector<16x32xf32>
    %107 = vector.shape_cast %103 : vector<16x32xf32> to vector<1x16x32xf32>
    %108 = vector.shape_cast %104 : vector<16x32xf32> to vector<1x16x32xf32>
    %109 = vector.shape_cast %105 : vector<16x32xf32> to vector<1x16x32xf32>
    %110 = vector.shape_cast %106 : vector<16x32xf32> to vector<1x16x32xf32>
    %111 = tpu.concatenate %107, %108, %109, %110 in 0 : vector<1x16x32xf32>, vector<1x16x32xf32>, vector<1x16x32xf32>, vector<1x16x32xf32> -> vector<4x16x32xf32>
    %112 = arith.truncf %111 : vector<4x16x32xf32> to vector<4x16x32xbf16>
    %113 = vector.extract_strided_slice %32 {offsets = [16, 0], sizes = [16, 128], strides = [1, 1]} : vector<32x128xf32> to vector<16x128xf32>
    %114 = vector.extract_strided_slice %113 {offsets = [0, 0], sizes = [16, 32], strides = [1, 1]} : vector<16x128xf32> to vector<16x32xf32>
    %115 = vector.extract_strided_slice %113 {offsets = [0, 32], sizes = [16, 32], strides = [1, 1]} : vector<16x128xf32> to vector<16x32xf32>
    %116 = vector.extract_strided_slice %113 {offsets = [0, 64], sizes = [16, 32], strides = [1, 1]} : vector<16x128xf32> to vector<16x32xf32>
    %117 = vector.extract_strided_slice %113 {offsets = [0, 96], sizes = [16, 32], strides = [1, 1]} : vector<16x128xf32> to vector<16x32xf32>
    %118 = vector.shape_cast %114 : vector<16x32xf32> to vector<1x16x32xf32>
    %119 = vector.shape_cast %115 : vector<16x32xf32> to vector<1x16x32xf32>
    %120 = vector.shape_cast %116 : vector<16x32xf32> to vector<1x16x32xf32>
    %121 = vector.shape_cast %117 : vector<16x32xf32> to vector<1x16x32xf32>
    %122 = tpu.concatenate %118, %119, %120, %121 in 0 : vector<1x16x32xf32>, vector<1x16x32xf32>, vector<1x16x32xf32>, vector<1x16x32xf32> -> vector<4x16x32xf32>
    %123 = arith.truncf %122 : vector<4x16x32xf32> to vector<4x16x32xbf16>
    "tpu.trace_start"() <{level = 10 : i32, message = "hqd,hkd->hqk"}> : () -> ()
    %cst_23 = arith.constant dense<0.000000e+00> : vector<4x16x16xf32>
    %124 = tpu.matmul %101, %112, %cst_23 {dimension_numbers = #tpu.dot_dimension_numbers<[2], [2], [1], [1], [0, 0, 0, 1, 1, 1], [0], [0]>} : vector<4x16x32xbf16>, vector<4x16x32xbf16>, vector<4x16x16xf32> -> vector<4x16x16xf32>
    %cst_24 = arith.constant -1.000000e+30 : f32
    "tpu.trace_stop"() : () -> ()
    %125 = vector.shape_cast %36 : vector<1x16x16xi1> to vector<1x16x16xi1>
    %126 = vector.broadcast %125 : vector<1x16x16xi1> to vector<4x16x16xi1>
    %127 = vector.broadcast %cst_24 : f32 to vector<4x16x16xf32>
    %128 = arith.select %126, %124, %127 : vector<4x16x16xi1>, vector<4x16x16xf32>
    %cst_25 = arith.constant dense<0xFF800000> : vector<4x16xf32>
    %129 = vector.multi_reduction <maximumf>, %128, %cst_25 [2] : vector<4x16x16xf32> to vector<4x16xf32>
    %130 = vector.shape_cast %129 : vector<4x16xf32> to vector<4x16x1xf32>
    %131 = vector.broadcast %130 : vector<4x16x1xf32> to vector<4x16x16xf32>
    %132 = arith.subf %128, %131 : vector<4x16x16xf32>
    %133 = math.exp %132 : vector<4x16x16xf32>
    %cst_26 = arith.constant dense<0.000000e+00> : vector<4x16xf32>
    %134 = vector.multi_reduction <add>, %133, %cst_26 [2] : vector<4x16x16xf32> to vector<4x16xf32>
    %135 = vector.shape_cast %134 : vector<4x16xf32> to vector<4x16x1xf32>
    %136 = tpu.reciprocal %135 {approx = true} : vector<4x16x1xf32> -> vector<4x16x1xf32>
    %137 = vector.broadcast %136 : vector<4x16x1xf32> to vector<4x16x16xf32>
    %138 = arith.mulf %133, %137 : vector<4x16x16xf32>
    %139 = arith.truncf %138 : vector<4x16x16xf32> to vector<4x16x16xbf16>
    "tpu.trace_start"() <{level = 10 : i32, message = "hqk,hkd->hqd"}> : () -> ()
    %cst_27 = arith.constant dense<0.000000e+00> : vector<4x16x32xf32>
    %140 = tpu.matmul %139, %123, %cst_27 {dimension_numbers = #tpu.dot_dimension_numbers<[2], [1], [1], [2], [0, 0, 0, 1, 1, 2], [0], [0]>} : vector<4x16x16xbf16>, vector<4x16x32xbf16>, vector<4x16x32xf32> -> vector<4x16x32xf32>
    "tpu.trace_stop"() : () -> ()
    %141 = arith.truncf %140 : vector<4x16x32xf32> to vector<4x16x32xbf16>
    "tpu.trace_start"() <{level = 10 : i32, message = "hqd,hdc->hqc"}> : () -> ()
    %cst_28 = arith.constant dense<0.000000e+00> : vector<4x16x128xf32>
    %142 = tpu.matmul %141, %37, %cst_28 {dimension_numbers = #tpu.dot_dimension_numbers<[2], [1], [1], [2], [0, 0, 0, 1, 1, 2], [0], [0]>} : vector<4x16x32xbf16>, vector<4x32x128xbf16>, vector<4x16x128xf32> -> vector<4x16x128xf32>
    "tpu.trace_stop"() : () -> ()
    %cst_29 = arith.constant dense<0.000000e+00> : vector<16x128xf32>
    %143 = vector.multi_reduction <add>, %142, %cst_29 [0] : vector<4x16x128xf32> to vector<16x128xf32>
    %144 = tpu.concatenate %90, %143 in 0 : vector<16x128xf32>, vector<16x128xf32> -> vector<32x128xf32>
    %145 = arith.addf %0, %144 : vector<32x128xf32>
    %c0_30 = arith.constant 0 : index
    %c0_31 = arith.constant 0 : index
    %146 = vector.load %arg5[%c0_30, %c0_31] : memref<1x128xf32, #tpu.memory_space<vmem>>, vector<1x128xf32>
    %147 = vector.broadcast %146 : vector<1x128xf32> to vector<32x128xf32>
    %148 = arith.addf %145, %147 : vector<32x128xf32>
    %c0_32 = arith.constant 0 : index
    %c0_33 = arith.constant 0 : index
    %149 = vector.load %arg6[%c0_32, %c0_33] : memref<1x128xf32, #tpu.memory_space<vmem>>, vector<1x128xf32>
    %c0_34 = arith.constant 0 : index
    %c0_35 = arith.constant 0 : index
    %150 = vector.load %arg7[%c0_34, %c0_35] : memref<1x128xf32, #tpu.memory_space<vmem>>, vector<1x128xf32>
    %cst_36 = arith.constant dense<0.000000e+00> : vector<32xf32>
    %151 = vector.multi_reduction <add>, %148, %cst_36 [1] : vector<32x128xf32> to vector<32xf32>
    %152 = vector.shape_cast %151 : vector<32xf32> to vector<32x1xf32>
    %cst_37 = arith.constant 1.280000e+02 : f32
    %153 = vector.broadcast %cst_37 : f32 to vector<32x1xf32>
    %154 = arith.divf %152, %153 : vector<32x1xf32>
    %155 = vector.broadcast %154 : vector<32x1xf32> to vector<32x128xf32>
    %156 = arith.subf %148, %155 : vector<32x128xf32>
    %157 = arith.mulf %156, %156 : vector<32x128xf32>
    %cst_38 = arith.constant dense<0.000000e+00> : vector<32xf32>
    %158 = vector.multi_reduction <add>, %157, %cst_38 [1] : vector<32x128xf32> to vector<32xf32>
    %159 = vector.shape_cast %158 : vector<32xf32> to vector<32x1xf32>
    %cst_39 = arith.constant 1.280000e+02 : f32
    %160 = vector.broadcast %cst_39 : f32 to vector<32x1xf32>
    %161 = arith.divf %159, %160 : vector<32x1xf32>
    %162 = vector.broadcast %154 : vector<32x1xf32> to vector<32x128xf32>
    %163 = arith.subf %148, %162 : vector<32x128xf32>
    %cst_40 = arith.constant 9.99999974E-6 : f32
    %164 = vector.broadcast %cst_40 : f32 to vector<32x1xf32>
    %165 = arith.addf %161, %164 : vector<32x1xf32>
    %166 = math.rsqrt %165 : vector<32x1xf32>
    %167 = vector.broadcast %166 : vector<32x1xf32> to vector<32x128xf32>
    %168 = arith.mulf %163, %167 : vector<32x128xf32>
    %169 = vector.broadcast %149 : vector<1x128xf32> to vector<32x128xf32>
    %170 = arith.mulf %168, %169 : vector<32x128xf32>
    %171 = vector.broadcast %150 : vector<1x128xf32> to vector<32x128xf32>
    %172 = arith.addf %170, %171 : vector<32x128xf32>
    %173 = arith.truncf %172 : vector<32x128xf32> to vector<32x128xbf16>
    %c0_41 = arith.constant 0 : index
    %c0_42 = arith.constant 0 : index
    %174 = vector.load %arg8[%c0_41, %c0_42] : memref<128x512xbf16, #tpu.memory_space<vmem>>, vector<128x512xbf16>
    %cst_43 = arith.constant dense<0.000000e+00> : vector<32x512xf32>
    %175 = tpu.matmul %173, %174, %cst_43 {dimension_numbers = #tpu.dot_dimension_numbers<[1], [0], [0], [1], [0, 0, 1, 1], [], []>} : vector<32x128xbf16>, vector<128x512xbf16>, vector<32x512xf32> -> vector<32x512xf32>
    %c0_44 = arith.constant 0 : index
    %c0_45 = arith.constant 0 : index
    %176 = vector.load %arg9[%c0_44, %c0_45] : memref<1x512xf32, #tpu.memory_space<vmem>>, vector<1x512xf32>
    %177 = vector.broadcast %176 : vector<1x512xf32> to vector<32x512xf32>
    %178 = arith.addf %175, %177 : vector<32x512xf32>
    %cst_46 = arith.constant 0.000000e+00 : f32
    %179 = vector.broadcast %cst_46 : f32 to vector<32x512xf32>
    %180 = arith.maximumf %178, %179 : vector<32x512xf32>
    %181 = arith.truncf %180 : vector<32x512xf32> to vector<32x512xbf16>
    %c0_47 = arith.constant 0 : index
    %c0_48 = arith.constant 0 : index
    %182 = vector.load %arg10[%c0_47, %c0_48] : memref<512x128xbf16, #tpu.memory_space<vmem>>, vector<512x128xbf16>
    %cst_49 = arith.constant dense<0.000000e+00> : vector<32x128xf32>
    %183 = tpu.matmul %181, %182, %cst_49 {dimension_numbers = #tpu.dot_dimension_numbers<[1], [0], [0], [1], [0, 0, 1, 1], [], []>} : vector<32x512xbf16>, vector<512x128xbf16>, vector<32x128xf32> -> vector<32x128xf32>
    %c0_50 = arith.constant 0 : index
    %c0_51 = arith.constant 0 : index
    %184 = vector.load %arg11[%c0_50, %c0_51] : memref<1x128xf32, #tpu.memory_space<vmem>>, vector<1x128xf32>
    %185 = vector.broadcast %184 : vector<1x128xf32> to vector<32x128xf32>
    %186 = arith.addf %183, %185 : vector<32x128xf32>
    %187 = arith.addf %148, %186 : vector<32x128xf32>
    %c0_52 = arith.constant 0 : index
    %c0_53 = arith.constant 0 : index
    %188 = vector.load %arg12[%c0_52, %c0_53] : memref<32x128xf32, #tpu.memory_space<vmem>>, vector<32x128xf32>
    tpu.vector_store %arg12[%c0_52, %c0_53], %187 {strides = array<i32>} : memref<32x128xf32, #tpu.memory_space<vmem>>, vector<32x128xf32>,
    return
  }
}

</mosaic_0001>

<bundles_post_ra>
// kernel: tpu_custom_call.1
= control target key start
LH: loop header
LB: loop body
LE: loop exit
PB: predicated region body
PF: predicated region fallthrough
CT: control target
= control target key end

     0   :  { %17 = vsyncpa [#allocation3], 0  ;;  %s4204_s0 = inlined_call_operand.hbm [shape: f32[32,128], index: 0, kind: input, shape index: {}]   ;;  %s4205_s1 = inlined_call_operand.vmem [shape: f32[1,128], index: 1, kind: input, shape index: {}]   ;;  %s4206_s2 = inlined_call_operand.vmem [shape: f32[1,128], index: 2, kind: input, shape index: {}]   ;;  %s4207_s3 = inlined_call_operand.hbm [shape: bf16[128,384], index: 3, kind: input, shape index: {}]   ;;  %s4208_s4 = inlined_call_operand.hbm [shape: bf16[4,32,128], index: 4, kind: input, shape index: {}]   ;;  %s4209_s5 = inlined_call_operand.vmem [shape: f32[1,128], index: 5, kind: input, shape index: {}]   ;;  %s4210_s6 = inlined_call_operand.vmem [shape: f32[1,128], index: 6, kind: input, shape index: {}]   ;;  %s4211_s7 = inlined_call_operand.vmem [shape: f32[1,128], index: 7, kind: input, shape index: {}]   ;;  %s4212_s8 = inlined_call_operand.hbm [shape: bf16[128,512], index: 8, kind: input, shape index: {}]   ;;  %s4213_s9 = inlined_call_operand.vmem [shape: f32[1,512], index: 9, kind: input, shape index: {}]   ;;  %s4214_s10 = inlined_call_operand.hbm [shape: bf16[512,128], index: 10, kind: input, shape index: {}]   ;;  %s4215_s11 = inlined_call_operand.vmem [shape: f32[1,128], index: 11, kind: input, shape index: {}]   ;;  %s4216_s12 = inlined_call_operand.hbm [shape: f32[32,128], index: 12, kind: output, shape index: {}]  }
   0x1   :  { %18 = vsyncpa [#allocation6], 0 }
   0x2   :  { %19 = vsyncpa [#allocation9], 0 }
   0x3   :  { %20 = vsyncpa [#allocation4], 0  ;;  %s3655_s21 = smov [#allocation5]  }
   0x4   :  { %s42_s22 = sshll.u32 %s3655_s21, 4  ;;  %s43_s22 = int_to_ptr.vmem [resolvable:$true] %s42_s22 }
   0x5   :  { %s3535_s23 = scalar_lea.vmem %s43_s22, 3072  ;;  %p3540_p1 = scmp.lt.s32.totalorder %s43_s22, %s43_s22 }
   0x6   :  { %p3536_p0 = scmp.ne.s32.totalorder %s43_s22, %s3535_s23  ;;  %p3541_p2 = scmp.lt.s32.totalorder %s3535_s23, %s3535_s23 }
   0x8   :  { %p3542_p3 = por %p3541_p2, %p3540_p1 }
   0xa   :  { %p3543_p4 = pnand %p3542_p3, %p3536_p0 }
   0xc   :  { %3546 = shalt.err (!%p3543_p4)
}
   0xd   :  { %s3656_s24 = smov 192   ;;  %s3657_s25 = smov 12  }
   0xe   :  { %48 = dma.hbm_to_vmem [thread:$0]  %s4207_s3, 3072, %s43_s22, [#allocation6], %s3656_s24, %s3656_s24, %s3657_s25  }
   0xf   :  { %s3658_s28 = smov [#allocation8]  }
  0x10   :  { %s72_s29 = sshll.u32 %s3658_s28, 4  ;;  %s73_s29 = int_to_ptr.vmem [resolvable:$true] %s72_s29 }
  0x11   :  { %s3555_s30 = scalar_lea.vmem %s73_s29, 4096  ;;  %p3560_p6 = scmp.lt.s32.totalorder %s73_s29, %s73_s29 }
  0x12   :  { %p3556_p5 = scmp.ne.s32.totalorder %s73_s29, %s3555_s30  ;;  %p3561_p7 = scmp.lt.s32.totalorder %s3555_s30, %s3555_s30 }
  0x14   :  { %p3562_p8 = por %p3561_p7, %p3560_p6 }
  0x16   :  { %p3563_p9 = pnand %p3562_p8, %p3556_p5 }
  0x18   :  { %3566 = shalt.err (!%p3563_p9)
}
  0x19   :  { %s3659_s13 = smov 256   ;;  %s3660_s14 = smov 16  }
  0x1a   :  { %78 = dma.hbm_to_vmem [thread:$0]  %s4212_s8, 4096, %s73_s29, [#allocation9], %s3659_s13, %s3659_s13, %s3660_s14  }
  0x1b   :  { %s3661_s17 = smov [#allocation2]  }
  0x1c   :  { %s26_s18 = sshll.u32 %s3661_s17, 4  ;;  %s27_s18 = int_to_ptr.vmem [resolvable:$true] %s26_s18 }
  0x1d   :  { %s3575_s3 = scalar_lea.vmem %s27_s18, 512  ;;  %p3580_p11 = scmp.lt.s32.totalorder %s27_s18, %s27_s18 }
  0x1e   :  { %p3576_p10 = scmp.ne.s32.totalorder %s27_s18, %s3575_s3  ;;  %p3581_p12 = scmp.lt.s32.totalorder %s3575_s3, %s3575_s3 }
  0x20   :  { %p3582_p13 = por %p3581_p12, %p3580_p11 }
  0x22   :  { %p3583_p0 = pnand %p3582_p13, %p3576_p10 }
  0x24   :  { %3586 = shalt.err (!%p3583_p0)
}
  0x25   :  { %s3662_s19 = smov 128   ;;  %s3663_s20 = smov 8  }
  0x26   :  { %32 = dma.hbm_to_vmem [thread:$0]  %s4204_s0, 512, %s27_s18, [#allocation3], %s3662_s19, %s3662_s19, %s3663_s20  }
  0x27   :  { %s3664_s8 = smov [#allocation7]  }
  0x28   :  { %s54_s23 = sshll.u32 %s3664_s8, 4  ;;  %s55_s23 = int_to_ptr.vmem [resolvable:$true] %s54_s23 }
  0x29   :  { %s3595_s24 = scalar_lea.vmem %s55_s23, 1024  ;;  %p3600_p2 = scmp.lt.s32.totalorder %s55_s23, %s55_s23 }
  0x2a   :  { %p3596_p1 = scmp.ne.s32.totalorder %s55_s23, %s3595_s24  ;;  %p3601_p3 = scmp.lt.s32.totalorder %s3595_s24, %s3595_s24 }
  0x2c   :  { %p3602_p4 = por %p3601_p3, %p3600_p2 }
  0x2e   :  { %p3603_p5 = pnand %p3602_p4, %p3596_p1 }
  0x30   :  { %3606 = shalt.err (!%p3603_p5)
}
  0x31   :  { %s3665_s25 = smov 64   ;;  %s3666_s26 = smov 4  }
  0x32   :  { %60 = dma.hbm_to_vmem [thread:$0]  %s4208_s4, 1024, %s55_s23, [#allocation6], %s3665_s25, %s3665_s25, %s3666_s26  }
  0x33   :  { %s3667_s29 = smov [#allocation10]  }
  0x34   :  { %s86_s0 = sshll.u32 %s3667_s29, 4  ;;  %s87_s0 = int_to_ptr.vmem [resolvable:$true] %s86_s0 }
  0x35   :  { %s3615_s30 = scalar_lea.vmem %s87_s0, 4096  ;;  %p3620_p7 = scmp.lt.s32.totalorder %s87_s0, %s87_s0 }
  0x36   :  { %p3616_p6 = scmp.ne.s32.totalorder %s87_s0, %s3615_s30  ;;  %p3621_p8 = scmp.lt.s32.totalorder %s3615_s30, %s3615_s30 }
  0x38   :  { %p3622_p9 = por %p3621_p8, %p3620_p7 }
  0x3a   :  { %p3623_p10 = pnand %p3622_p9, %p3616_p6 }
  0x3c   :  { %3626 = shalt.err (!%p3623_p10)
}
  0x3d   :  { %92 = dma.hbm_to_vmem [thread:$0]  %s4214_s10, 4096, %s87_s0, [#allocation9], %s3665_s25, %s3665_s25, %s3666_s26  }
  0x3e   :  { %3647 = dma.done.wait [#allocation3], 512  }
  0x3f   :  { %3648 = vsyncadd [#allocation3], 4294966784 }
  0x40   :  { %3649 = dma.done.wait [#allocation6], 4096  }
  0x41   :  { %3650 = vsyncadd [#allocation6], 4294963200 }
  0x42   :  { %3651 = dma.done.wait [#allocation9], 8192  }
  0x43   :  { %3652 = vsyncadd [#allocation9], 4294959104  ;;  %v111_v0 = vld [vmem:[#allocation2] sm:$0xff]  ;;  %v112_v1 = vld [vmem:[#allocation2 + $0x8] sm:$0xff]  ;;  %v3668_v28 = vmov 0   ;;  %v3669_v62 = vmov 0.0  }
  0x44   :  { %117 = vadd.xlane.f32.xlu0 %v111_v0  ;;  %v113_v2 = vld [vmem:[#allocation2 + $0x10] sm:$0xff]  ;;  %v3323_v3 = vld [vmem:[#allocation5 + $0xac] ss:$12 sps:$4 sm:$0xff]   ;;  %v3329_v16 = vld [vmem:[#allocation5 + $0x7c] ss:$12 sps:$4 sm:$0xff]   ;;  %376 = vmatprep.mubr.bf16.mxu0 %v3668_v28  ;;  %vm3670_vm0 = vmmov 0  }
  0x45   :  { %v3325_v4 = vld [vmem:[#allocation5 + $0xa8] ss:$12 sps:$4 sm:$0xff]   ;;  %344 = vmatprep.subr.bf16.mxu0 %v3323_v3  ;;  %v114_v13 = vld [vmem:[#allocation2 + $0x18] sm:$0xff]  ;;  %v3332_v18 = vld [vmem:[#allocation5 + $0x64] ss:$12 sps:$4 sm:$0xff]   ;;  %vm545_vm1 = vcmask 261120  }
  0x46   :  { %345 = vmatpush1.bf16.msra.mxu0 %v3325_v4  ;;  %v3326_v14 = vld [vmem:[#allocation5 + $0x94] ss:$12 sps:$4 sm:$0xff]   ;;  %v3328_v15 = vld [vmem:[#allocation5 + $0x90] ss:$12 sps:$4 sm:$0xff]   ;;  %v3331_v17 = vld [vmem:[#allocation5 + $0x78] ss:$12 sps:$4 sm:$0xff]  }
  0x47   :  { %346 = vmatprep.subr.bf16.mxu0 %v3326_v14  ;;  %v3334_v19 = vld [vmem:[#allocation5 + $0x60] ss:$12 sps:$4 sm:$0xff]   ;;  %v3337_v22 = vld [vmem:[#allocation5 + $0x48] ss:$12 sps:$4 sm:$0xff]   ;;  %v3340_v26 = vld [vmem:[#allocation5 + $0x30] ss:$12 sps:$4 sm:$0xff]  }
  0x48   :  { %119 = vadd.xlane.f32.xlu0 %v112_v1  ;;  %v3335_v20 = vld [vmem:[#allocation5 + $0x4c] ss:$12 sps:$4 sm:$0xff]   ;;  %v3338_v24 = vld [vmem:[#allocation5 + $0x34] ss:$12 sps:$4 sm:$0xff]   ;;  %v3341_v29 = vld [vmem:[#allocation5 + $0x1c] ss:$12 sps:$4 sm:$0xff]  }
  0x49   :  { %v3343_v30 = vld [vmem:[#allocation5 + $0x18] ss:$12 sps:$4 sm:$0xff]   ;;  %v3346_v32 = vld [vmem:[#allocation5] ss:$12 sps:$4 sm:$0xff]   ;;  %v3347_v33 = vld [vmem:[#allocation5 + $0xb0] ss:$12 sps:$4 sm:$0xff]  }
  0x4a   :  { %347 = vmatpush1.bf16.msra.mxu0 %v3328_v15  ;;  %v3344_v31 = vld [vmem:[#allocation5 + $0x4] ss:$12 sps:$4 sm:$0xff]   ;;  %3034 = vmatprep.subr.bf16.mxu1 %v3347_v33  ;;  %v2786_v47 = vld [vmem:[%s4205_s1] ss:$0 sm:$0xff]  ;;  %v3350_v57 = vld [vmem:[#allocation5 + $0x68] ss:$12 sps:$4 sm:$0xff]  }
  0x4b   :  { %348 = vmatprep.subr.bf16.mxu0 %v3329_v16  ;;  %v3348_v34 = vld [vmem:[#allocation5 + $0x98] ss:$12 sps:$4 sm:$0xff]   ;;  %3035 = vmatpush3.bf16.msra.mxu1 %v3347_v33  ;;  %v2787_v51 = vld [vmem:[%s4206_s2] ss:$0 sm:$0xff]  ;;  %v3351_v58 = vld [vmem:[#allocation5 + $0x50] ss:$12 sps:$4 sm:$0xff]  }
  0x4c   :  { %121 = vadd.xlane.f32.xlu0 %v113_v2  ;;  %3036 = vmatprep.subr.bf16.mxu1 %v3348_v34  ;;  %v3349_v56 = vld [vmem:[#allocation5 + $0x80] ss:$12 sps:$4 sm:$0xff]   ;;  %v3352_v59 = vld [vmem:[#allocation5 + $0x38] ss:$12 sps:$4 sm:$0xff]   ;;  %v3354_v61 = vld [vmem:[#allocation5 + $0x8] ss:$12 sps:$4 sm:$0xff]  }
  0x4d   :  { %v3353_v60 = vld [vmem:[#allocation5 + $0x20] ss:$12 sps:$4 sm:$0xff]   ;;  %s3671_s1 = smov 96   ;;  %s3672_s2 = smov 32   ;;  %vm746_vm3 = vcmask 130048  }
  0x4e   :  { %349 = vmatpush1.bf16.msra.mxu0 %v3331_v17 }
  0x4f   :  { %350 = vmatprep.subr.bf16.mxu0 %v3332_v18  ;;  %3037 = vmatpush3.bf16.msra.mxu1 %v3348_v34 }
  0x50   :  { %3038 = vmatprep.subr.bf16.mxu1 %v3349_v56 }
  0x52   :  { %351 = vmatpush1.bf16.msra.mxu0 %v3334_v19 }
  0x53   :  { %352 = vmatprep.subr.bf16.mxu0 %v3335_v20  ;;  %3039 = vmatpush3.bf16.msra.mxu1 %v3349_v56 }
  0x54   :  { %3040 = vmatprep.subr.bf16.mxu1 %v3350_v57 }
  0x56   :  { %353 = vmatpush1.bf16.msra.mxu0 %v3337_v22 }
  0x57   :  { %354 = vmatprep.subr.bf16.mxu0 %v3338_v24  ;;  %3041 = vmatpush3.bf16.msra.mxu1 %v3350_v57 }
  0x58   :  { %3042 = vmatprep.subr.bf16.mxu1 %v3351_v58 }
  0x5a   :  { %355 = vmatpush1.bf16.msra.mxu0 %v3340_v26 }
  0x5b   :  { %356 = vmatprep.subr.bf16.mxu0 %v3341_v29  ;;  %3043 = vmatpush3.bf16.msra.mxu1 %v3351_v58 }
  0x5c   :  { %3044 = vmatprep.subr.bf16.mxu1 %v3352_v59 }
  0x5e   :  { %357 = vmatpush1.bf16.msra.mxu0 %v3343_v30 }
  0x5f   :  { %358 = vmatprep.subr.bf16.mxu0 %v3344_v31  ;;  %3045 = vmatpush3.bf16.msra.mxu1 %v3352_v59 }
  0x60   :  { %3046 = vmatprep.subr.bf16.mxu1 %v3353_v60 }
  0x62   :  { %359 = vmatpush1.bf16.msra.mxu0 %v3346_v32 }
  0x63   :  { %3047 = vmatpush3.bf16.msra.mxu1 %v3353_v60  ;;  %3060 = vmatprep.subr.bf16.mxu0 %v3669_v62 }
  0x64   :  { %3048 = vmatprep.subr.bf16.mxu1 %v3354_v61 }
  0x67   :  { %3049 = vmatpush3.bf16.msra.mxu1 %v3354_v61 }
  0x68   :  { %3054 = vmatprep.subr.bf16.mxu1 %v3669_v62 }
  0xcd   :  { %v118_v5 = vpop.xlane.xlu0 %117 }
  0xce   :  { %v126_v6 = vmul.f32 0.0078125, %v118_v5 }
  0xd0   :  { %v3761_v7 = vsub.f32 %v111_v0, %v126_v6 }
  0xd1   :  { %v120_v8 = vpop.xlane.xlu0 %119 }
  0xd2   :  { %v127_v9 = vmul.f32 0.0078125, %v120_v8  ;;  %v134_v10 = vmul.f32 %v3761_v7, %v3761_v7 }
  0xd4   :  { %v3765_v11 = vsub.f32 %v112_v1, %v127_v9  ;;  %138 = vadd.xlane.f32.xlu1 %v134_v10 }
  0xd5   :  { %v122_v21 = vpop.xlane.xlu0 %121 }
  0xd6   :  { %v135_v12 = vmul.f32 %v3765_v11, %v3765_v11  ;;  %v128_v23 = vmul.f32 0.0078125, %v122_v21 }
  0xd8   :  { %140 = vadd.xlane.f32.xlu1 %v135_v12  ;;  %v3769_v25 = vsub.f32 %v113_v2, %v128_v23 }
  0xda   :  { %v136_v27 = vmul.f32 %v3769_v25, %v3769_v25 }
  0xdc   :  { %123 = vadd.xlane.f32.xlu1 %v114_v13  ;;  %142 = vadd.xlane.f32.xlu0 %v136_v27 }
 0x15d   :  { %v139_v35 = vpop.xlane.xlu1 %138 }
 0x15e   :  { %v146_v36 = vmul.f32 0.0078125, %v139_v35 }
 0x160   :  { %v150_v37 = vadd.f32 1e-05, %v146_v36 }
 0x161   :  { %v141_v38 = vpop.xlane.xlu1 %140 }
 0x162   :  { %3443 = vrsqrt.f32 %v150_v37  ;;  %v147_v39 = vmul.f32 0.0078125, %v141_v38 }
 0x164   :  { %v151_v40 = vadd.f32 1e-05, %v147_v39 }
 0x165   :  { %v124_v41 = vpop.xlane.xlu1 %123  ;;  %v143_v63 = vpop.xlane.xlu0 %142 }
 0x166   :  { %3445 = vrsqrt.f32 %v151_v40  ;;  %v129_v42 = vmul.f32 0.0078125, %v124_v41  ;;  %v148_v0 = vmul.f32 0.0078125, %v143_v63 }
 0x168   :  { %v133_v43 = vsub.f32 %v114_v13, %v129_v42  ;;  %v152_v1 = vadd.f32 1e-05, %v148_v0 }
 0x16a   :  { %v137_v44 = vmul.f32 %v133_v43, %v133_v43  ;;  %3447 = vrsqrt.f32 %v152_v1 }
 0x16c   :  { %144 = vadd.xlane.f32.xlu1 %v137_v44 }
 0x16f   :  { %v3444_v45 = vpop.eup %3443 }
 0x170   :  { %v158_v46 = vmul.f32 %v3444_v45, %v3761_v7 }
 0x172   :  { %v168_v50 = vmul.f32 %v2786_v47, %v158_v46 }
 0x173   :  { %v3446_v48 = vpop.eup %3445 }
 0x174   :  { %v159_v49 = vmul.f32 %v3446_v48, %v3765_v11  ;;  %v178_v53 = vadd.f32 %v2787_v51, %v168_v50 }
 0x176   :  { %v169_v52 = vmul.f32 %v2786_v47, %v159_v49 }
 0x177   :  { %v3448_v5 = vpop.eup %3447 }
 0x178   :  { %v179_v54 = vadd.f32 %v2787_v51, %v169_v52  ;;  %v160_v6 = vmul.f32 %v3448_v5, %v3769_v25  ;;  %v450_v5 = vlaneseq }
 0x17a   :  { %v182_v55 = vpack.c.bf16 %v179_v54, %v178_v53  ;;  %v170_v7 = vmul.f32 %v2786_v47, %v160_v6  ;;  %v3841_v6 = vshrl.u32 %v450_v5, 7 }
 0x17c   :  { %377 = vmatmul.mubr.bf16.vlgmr.msra.gmra.mxu0 %v182_v55  ;;  %3050 = vmatprep.mubr.bf16.mxu1 %v182_v55  ;;  %v180_v11 = vadd.f32 %v2787_v51, %v170_v7  ;;  %v454_v7 = vand.u32 127, %v450_v5 }
 0x17d   :  { %386 = vmatprep.mubr.bf16.mxu0 %v3668_v28 }
 0x17e   :  { %vm3844_vm2 = vcmp.le.s32.totalorder %v454_v7, %v3841_v6 }
 0x1f5   :  { %v145_v2 = vpop.xlane.xlu1 %144 }
 0x1f6   :  { %v149_v3 = vmul.f32 0.0078125, %v145_v2 }
 0x1f8   :  { %v153_v4 = vadd.f32 1e-05, %v149_v3 }
 0x1fa   :  { %3449 = vrsqrt.f32 %v153_v4 }
 0x207   :  { %v3450_v8 = vpop.eup %3449 }
 0x208   :  { %v161_v9 = vmul.f32 %v3450_v8, %v133_v43 }
 0x20a   :  { %v171_v10 = vmul.f32 %v2786_v47, %v161_v9  ;;  %v452_v9 = vadd.s32 8, %v3841_v6 }
 0x20c   :  { %v181_v12 = vadd.f32 %v2787_v51, %v171_v10  ;;  %vm3852_vm4 = vcmp.le.s32.totalorder %v454_v7, %v452_v9 }
 0x20e   :  { %v183_v13 = vpack.c.bf16 %v181_v12, %v180_v11 }
 0x210   :  { %387 = vmatmul.mubr.bf16.gmra.mxu0 %v183_v13  ;;  %3051 = vmatmul.mubr.bf16.vlgmr.msra.gmra.mxu1 %v183_v13 }
 0x211   :  { %3056 = vmatprep.mubr.msk.bf16.mxu1 %vm3670_vm0, %v3669_v62  ;;  %3062 = vmatprep.mubr.msk.bf16.mxu0 %vm3670_vm0, %v3669_v62 }
 0x23c   :  { %v378_v14 = vpop.f32.mrf.mxu0 }
 0x23d   :  { %v446_v21 = vmul.f32 0.088388346, %v378_v14 }
 0x23e   :  { %v380_v15 = vpop.f32.mrf.mxu0 }
 0x240   :  { %v382_v16 = vpop.f32.mrf.mxu0 }
 0x241   :  { %v447_v18 = vmul.f32 0.088388346, %v382_v16 }
 0x242   :  { %v384_v17 = vpop.f32.mrf.mxu0 }
 0x243   :  { %v3238_v19 = vpack.i.bf16 %v384_v17, %v380_v15  ;;  %v517_v20 = vpack.c.bf16 %v384_v17, %v380_v15  ;;  %v3243_v23 = vpack.i.bf16 %v447_v18, %v446_v21  ;;  %v493_v24 = vpack.c.bf16 %v447_v18, %v446_v21 }
 0x245   :  { %3239 = vrot.lane.b32.xlu1 %v3238_v19, %s3665_s25  ;;  %3234 = vrot.lane.b32.xlu0 %v3238_v19, %s3671_s1  ;;  %v550_v22 = vsel %vm545_vm1, %v517_v20, 0 }
 0x246   :  { %3055 = vmatpush3.bf16.xpose.msra.mxu1 %v550_v22 }
 0x247   :  { %3066 = vmatprep.subr.bf16.mxu1 %v3669_v62 }
 0x249   :  { %3244 = vrot.lane.b32.xlu1 %v3243_v23, %s3671_s1  ;;  %3254 = vrot.lane.b32.xlu0 %v3243_v23, %s3665_s25 }
 0x24d   :  { %3249 = vrot.lane.b32.xlu1 %v3238_v19, %s3672_s2  ;;  %3057 = vmatmul.mubr.msk.bf16.vlgmr.msra.gmra.mxu1 %vm545_vm1, %v493_v24 }
 0x24e   :  { %3068 = vmatprep.mubr.msk.bf16.mxu1 %vm3670_vm0, %v3669_v62 }
 0x251   :  { %3259 = vrot.lane.b32.xlu1 %v3243_v23, %s3672_s2 }
 0x2b7   :  { %v3240_v25 = vpop.permute.xlu1 %3239  ;;  %v3235_v26 = vpop.permute.xlu0 %3234 }
 0x2b8   :  { %v3242_v27 = vunpack.i.h.bf16 %v3240_v25  ;;  %v3241_v29 = vunpack.i.l.bf16 %v3240_v25  ;;  %v3237_v30 = vunpack.i.h.bf16 %v3235_v26  ;;  %v3236_v31 = vunpack.i.l.bf16 %v3235_v26 }
 0x2ba   :  { %v519_v32 = vpack.c.bf16 %v3242_v27, %v3241_v29  ;;  %v518_v33 = vpack.c.bf16 %v3237_v30, %v3236_v31 }
 0x2bb   :  { %v3245_v34 = vpop.permute.xlu1 %3244  ;;  %v3255_v35 = vpop.permute.xlu0 %3254 }
 0x2bc   :  { %v597_v36 = vsel %vm545_vm1, %v518_v33, 0  ;;  %v644_v37 = vsel %vm545_vm1, %v519_v32, 0  ;;  %v3247_v38 = vunpack.i.h.bf16 %v3245_v34  ;;  %v3246_v39 = vunpack.i.l.bf16 %v3245_v34 }
 0x2bd   :  { %3061 = vmatpush3.bf16.xpose.msra.mxu0 %v597_v36  ;;  %3067 = vmatpush3.bf16.xpose.msra.mxu1 %v644_v37  ;;  %v3257_v40 = vunpack.i.h.bf16 %v3255_v35  ;;  %v3256_v41 = vunpack.i.l.bf16 %v3255_v35 }
 0x2be   :  { %3072 = vmatprep.subr.bf16.mxu0 %v3669_v62  ;;  %3078 = vmatprep.subr.bf16.mxu1 %v3669_v62  ;;  %v494_v46 = vpack.c.bf16 %v3247_v38, %v3246_v39 }
 0x2bf   :  { %v3250_v42 = vpop.permute.xlu1 %3249  ;;  %v495_v47 = vpack.c.bf16 %v3257_v40, %v3256_v41 }
 0x2c0   :  { %v3252_v43 = vunpack.i.h.bf16 %v3250_v42  ;;  %v3251_v44 = vunpack.i.l.bf16 %v3250_v42 }
 0x2c2   :  { %v520_v45 = vpack.c.bf16 %v3252_v43, %v3251_v44 }
 0x2c3   :  { %v3260_v48 = vpop.permute.xlu1 %3259 }
 0x2c4   :  { %v691_v49 = vsel %vm545_vm1, %v520_v45, 0  ;;  %3063 = vmatmul.mubr.msk.bf16.vlgmr.msra.gmra.mxu0 %vm545_vm1, %v494_v46  ;;  %3069 = vmatmul.mubr.msk.bf16.vlgmr.msra.gmra.mxu1 %vm545_vm1, %v495_v47  ;;  %v3262_v50 = vunpack.i.h.bf16 %v3260_v48  ;;  %v3261_v51 = vunpack.i.l.bf16 %v3260_v48 }
 0x2c5   :  { %3073 = vmatpush3.bf16.xpose.msra.mxu0 %v691_v49  ;;  %3074 = vmatprep.mubr.msk.bf16.mxu0 %vm3670_vm0, %v3669_v62 }
 0x2c6   :  { %3080 = vmatprep.mubr.msk.bf16.mxu1 %vm3670_vm0, %v3669_v62  ;;  %3084 = vmatprep.subr.bf16.mxu0 %v3669_v62  ;;  %v496_v52 = vpack.c.bf16 %v3262_v50, %v3261_v51 }
 0x2cc   :  { %3075 = vmatmul.mubr.msk.bf16.vlgmr.msra.gmra.mxu0 %vm545_vm1, %v496_v52 }
 0x2cd   :  { %3086 = vmatprep.mubr.msk.bf16.mxu0 %vm3670_vm0, %v3669_v62 }
 0x2d0   :  { %v388_v53 = vpop.f32.mrf.mxu0  ;;  %v3816_v54 = vpop.f32.mrf.mxu1 }
 0x2d1   :  { %v3820_v57 = vmul.f32 0.088388346, %v388_v53 }
 0x2d2   :  { %v3818_v55 = vpop.f32.mrf.mxu0  ;;  %v431_v56 = vpop.f32.mrf.mxu1 }
 0x2d4   :  { %v392_v58 = vpop.f32.mrf.mxu0  ;;  %v3822_v59 = vpop.f32.mrf.mxu1 }
 0x2d5   :  { %v3824_v60 = vmul.f32 0.088388346, %v392_v58  ;;  %v1317_v61 = vpack.c.bf16 %v3822_v59, %v3816_v54  ;;  %v3830_v63 = vpack.i.bf16 %v3822_v59, %v3816_v54 }
 0x2d6   :  { %v434_v0 = vpop.f32.mrf.mxu1  ;;  %v3859_v19 = vpop.f32.mrf.mxu0 }
 0x2d7   :  { %v1269_v1 = vpack.c.bf16 %v3824_v60, %v3820_v57  ;;  %v541_v2 = vpack.c.bf16 %v434_v0, %v431_v56  ;;  %v3834_v3 = vpack.i.bf16 %v434_v0, %v431_v56  ;;  %v3838_v4 = vpack.i.bf16 %v3824_v60, %v3820_v57 }
 0x2d9   :  { %3079 = vmatpush3.bf16.msra.mxu1 %v541_v2 }
 0x2da   :  { %3090 = vmatprep.subr.bf16.mxu1 %v3669_v62 }
 0x30d   :  { %v586_v10 = vpop.f32.mrf.mxu1 }
 0x30e   :  { %v738_v11 = vsel %vm3844_vm2, %v586_v10, -1e+30 }
 0x30f   :  { %v3058_v12 = vpop.f32.mrf.mxu1  ;;  %v747_v13 = vsel %vm746_vm3, %v738_v11, -inf }
 0x310   :  { %748 = vmax.xlane.f32.xlu0 %v747_v13 }
 0x311   :  { %v589_v15 = vpop.f32.mrf.mxu1 }
 0x312   :  { %v739_v16 = vsel %vm3852_vm4, %v589_v15, -1e+30 }
 0x313   :  { %v3059_v17 = vpop.f32.mrf.mxu1  ;;  %v750_v18 = vsel %vm746_vm3, %v739_v16, -inf }
 0x314   :  { %751 = vmax.xlane.f32.xlu1 %v750_v18 }
 0x384   :  { %v633_v20 = vpop.f32.mrf.mxu0  ;;  %v680_v21 = vpop.f32.mrf.mxu1 }
 0x385   :  { %v740_v22 = vsel %vm3844_vm2, %v633_v20, -1e+30  ;;  %v742_v35 = vsel %vm3844_vm2, %v680_v21, -1e+30 }
 0x386   :  { %v3064_v23 = vpop.f32.mrf.mxu0  ;;  %v3070_v24 = vpop.f32.mrf.mxu1  ;;  %v753_v25 = vsel %vm746_vm3, %v740_v22, -inf  ;;  %v759_v38 = vsel %vm746_vm3, %v742_v35, -inf }
 0x387   :  { %754 = vmax.xlane.f32.xlu0 %v753_v25 }
 0x388   :  { %v636_v26 = vpop.f32.mrf.mxu0  ;;  %v683_v27 = vpop.f32.mrf.mxu1 }
 0x389   :  { %v741_v29 = vsel %vm3852_vm4, %v636_v26, -1e+30  ;;  %v743_v30 = vsel %vm3852_vm4, %v683_v27, -1e+30 }
 0x38a   :  { %v3065_v31 = vpop.f32.mrf.mxu0  ;;  %v3071_v32 = vpop.f32.mrf.mxu1  ;;  %v762_v33 = vsel %vm746_vm3, %v743_v30, -inf  ;;  %v756_v34 = vsel %vm746_vm3, %v741_v29, -inf }
 0x38b   :  { %763 = vmax.xlane.f32.xlu1 %v762_v33  ;;  %757 = vmax.xlane.f32.xlu0 %v756_v34 }
 0x38c   :  { %v727_v36 = vpop.f32.mrf.mxu0 }
 0x38d   :  { %v744_v39 = vsel %vm3844_vm2, %v727_v36, -1e+30 }
 0x38e   :  { %v3076_v37 = vpop.f32.mrf.mxu0  ;;  %v765_v43 = vsel %vm746_vm3, %v744_v39, -inf }
 0x38f   :  { %760 = vmax.xlane.f32.xlu0 %v759_v38  ;;  %v3283_v37 = vpack.i.bf16 %v3859_v19, %v3818_v55 }
 0x390   :  { %v730_v40 = vpop.f32.mrf.mxu0 }
 0x391   :  { %v3877_v41 = vsel %vm3852_vm4, %v730_v40, -1e+30 }
 0x392   :  { %v3077_v42 = vpop.f32.mrf.mxu0  ;;  %v768_v44 = vsel %vm746_vm3, %v3877_v41, -inf }
 0x393   :  { %766 = vmax.xlane.f32.xlu0 %v765_v43  ;;  %769 = vmax.xlane.f32.xlu1 %v768_v44 }
 0x399   :  { %v749_v45 = vpop.xlane.xlu0 %748 }
 0x39a   :  { %v771_v46 = vsub.f32 %v738_v11, %v749_v45 }
 0x39c   :  { %v779_v47 = vmul.f32 1.442695, %v771_v46 }
 0x39d   :  { %v752_v48 = vpop.xlane.xlu1 %751 }
 0x39e   :  { %3451 = vpow2.f32 %v779_v47  ;;  %v772_v49 = vsub.f32 %v739_v16, %v752_v48 }
 0x3a0   :  { %v781_v50 = vmul.f32 1.442695, %v772_v49 }
 0x3a2   :  { %3453 = vpow2.f32 %v781_v50 }
 0x3ab   :  { %v3452_v51 = vpop.eup %3451 }
 0x3ac   :  { %v795_v52 = vsel %vm746_vm3, %v3452_v51, 0.0 }
 0x3ad   :  { %796 = vadd.xlane.f32.xlu0 %v795_v52 }
 0x3af   :  { %v3454_v53 = vpop.eup %3453 }
 0x3b0   :  { %v798_v56 = vsel %vm746_vm3, %v3454_v53, 0.0 }
 0x3b1   :  { %799 = vadd.xlane.f32.xlu1 %v798_v56 }
 0x410   :  { %v755_v58 = vpop.xlane.xlu0 %754 }
 0x411   :  { %v773_v0 = vsub.f32 %v740_v22, %v755_v58 }
 0x413   :  { %v783_v2 = vmul.f32 1.442695, %v773_v0 }
 0x414   :  { %v764_v5 = vpop.xlane.xlu1 %763  ;;  %v758_v7 = vpop.xlane.xlu0 %757 }
 0x415   :  { %3455 = vpow2.f32 %v783_v2  ;;  %v776_v9 = vsub.f32 %v743_v30, %v764_v5  ;;  %v774_v10 = vsub.f32 %v741_v29, %v758_v7 }
 0x417   :  { %v785_v11 = vmul.f32 1.442695, %v774_v10  ;;  %v789_v12 = vmul.f32 1.442695, %v776_v9 }
 0x418   :  { %v761_v13 = vpop.xlane.xlu0 %760 }
 0x419   :  { %v775_v15 = vsub.f32 %v742_v35, %v761_v13  ;;  %3457 = vpow2.f32 %v785_v11 }
 0x41a   :  { %3459 = vpow2.f32 %v789_v12 }
 0x41b   :  { %v787_v16 = vmul.f32 1.442695, %v775_v15  ;;  %v3931_v15 = vld [vmem:[#allocation7 + $0x8] sm:$0xff]  }
 0x41c   :  { %v767_v17 = vpop.xlane.xlu0 %766  ;;  %v770_v32 = vpop.xlane.xlu1 %769 }
 0x41d   :  { %3461 = vpow2.f32 %v787_v16  ;;  %v777_v18 = vsub.f32 %v744_v39, %v767_v17  ;;  %v778_v40 = vsub.f32 %v3877_v41, %v770_v32  ;;  %v3935_v17 = vld [vmem:[#allocation7] sm:$0xff]   ;;  %v3951_v32 = vld [vmem:[#allocation7 + $0x10] sm:$0xff]  }
 0x41f   :  { %v791_v20 = vmul.f32 1.442695, %v777_v18  ;;  %v793_v43 = vmul.f32 1.442695, %v778_v40 }
 0x421   :  { %3463 = vpow2.f32 %v791_v20 }
 0x422   :  { %v3884_v21 = vpop.eup %3455 }
 0x423   :  { %v801_v22 = vsel %vm746_vm3, %v3884_v21, 0.0 }
 0x424   :  { %802 = vadd.xlane.f32.xlu0 %v801_v22 }
 0x426   :  { %v3458_v23 = vpop.eup %3457 }
 0x427   :  { %v804_v24 = vsel %vm746_vm3, %v3458_v23, 0.0  ;;  %v3889_v25 = vpop.eup %3459 }
 0x428   :  { %805 = vadd.xlane.f32.xlu1 %v804_v24  ;;  %v810_v29 = vsel %vm746_vm3, %v3889_v25, 0.0 }
 0x42a   :  { %v3891_v26 = vpop.eup %3461 }
 0x42b   :  { %v807_v27 = vsel %vm746_vm3, %v3891_v26, 0.0 }
 0x42c   :  { %808 = vadd.xlane.f32.xlu0 %v807_v27  ;;  %811 = vadd.xlane.f32.xlu1 %v810_v29 }
 0x42e   :  { %v3897_v30 = vpop.eup %3463 }
 0x42f   :  { %v813_v31 = vsel %vm746_vm3, %v3897_v30, 0.0 }
 0x430   :  { %814 = vadd.xlane.f32.xlu0 %v813_v31  ;;  %v3947_v31 = vld [vmem:[#allocation7 + $0x18] sm:$0xff]  }
 0x436   :  { %v797_v33 = vpop.xlane.xlu0 %796 }
 0x437   :  { %3465 = vrcp.f32 %v797_v33 }
 0x43a   :  { %v800_v34 = vpop.xlane.xlu1 %799 }
 0x43b   :  { %3467 = vrcp.f32 %v800_v34 }
 0x43c   :  { %3469 = vpow2.f32 %v793_v43 }
 0x43d   :  { %3269 = vrot.lane.b32.xlu1 %v3834_v3, %s3665_s25 }
 0x444   :  { %v3466_v35 = vpop.eup %3465 }
 0x445   :  { %v827_v38 = vmul.f32 %v3466_v35, %v3452_v51  ;;  %v3955_v35 = vld [vmem:[#allocation7 + $0x28] sm:$0xff]  }
 0x446   :  { %3264 = vrot.lane.b32.xlu0 %v3834_v3, %s3671_s1 }
 0x448   :  { %v3468_v36 = vpop.eup %3467 }
 0x449   :  { %v828_v39 = vmul.f32 %v3468_v36, %v3454_v53  ;;  %v3470_v44 = vpop.eup %3469 }
 0x44a   :  { %3284 = vrot.lane.b32.xlu0 %v3283_v37, %s3665_s25  ;;  %v816_v45 = vsel %vm746_vm3, %v3470_v44, 0.0 }
 0x44b   :  { %v835_v42 = vpack.c.bf16 %v828_v39, %v827_v38  ;;  %v3959_v38 = vld [vmem:[#allocation7 + $0x20] sm:$0xff]  }
 0x44d   :  { %3081 = vmatmul.mubr.msk.bf16.vlgmr.msra.gmra.mxu1 %vm746_vm3, %v835_v42 }
 0x44e   :  { %3092 = vmatprep.mubr.msk.bf16.mxu1 %vm3670_vm0, %v3669_v62  ;;  %3294 = vrot.lane.b32.xlu0 %v3283_v37, %s3672_s2 }
 0x452   :  { %3304 = vrot.lane.b32.xlu0 %v3838_v4, %s3672_s2 }
 0x461   :  { %817 = vadd.xlane.f32.xlu1 %v816_v45 }
 0x472   :  { %3274 = vrot.lane.b32.xlu1 %v3834_v3, %s3672_s2 }
 0x476   :  { %3279 = vrot.lane.b32.xlu1 %v3283_v37, %s3671_s1 }
 0x47a   :  { %3289 = vrot.lane.b32.xlu1 %v3838_v4, %s3671_s1 }
 0x47e   :  { %3299 = vrot.lane.b32.xlu1 %v3838_v4, %s3665_s25 }
 0x4ad   :  { %v803_v41 = vpop.xlane.xlu0 %802 }
 0x4ae   :  { %3471 = vrcp.f32 %v803_v41 }
 0x4b1   :  { %v806_v46 = vpop.xlane.xlu1 %805 }
 0x4b2   :  { %3473 = vrcp.f32 %v806_v46 }
 0x4b5   :  { %v809_v47 = vpop.xlane.xlu0 %808  ;;  %v812_v48 = vpop.xlane.xlu1 %811 }
 0x4b6   :  { %3475 = vrcp.f32 %v809_v47 }
 0x4b7   :  { %3477 = vrcp.f32 %v812_v48  ;;  %v1293_v48 = vpack.c.bf16 %v3859_v19, %v3818_v55 }
 0x4b9   :  { %v815_v49 = vpop.xlane.xlu0 %814  ;;  %v3270_v50 = vpop.permute.xlu1 %3269 }
 0x4ba   :  { %v3272_v51 = vunpack.i.h.bf16 %v3270_v50  ;;  %v3271_v3 = vunpack.i.l.bf16 %v3270_v50  ;;  %3479 = vrcp.f32 %v815_v49 }
 0x4bb   :  { %v3472_v56 = vpop.eup %3471 }
 0x4bc   :  { %v543_v52 = vpack.c.bf16 %v3272_v51, %v3271_v3  ;;  %v829_v5 = vmul.f32 %v3472_v56, %v3884_v21  ;;  %v3975_v3 = vld [vmem:[#allocation7 + $0x30] sm:$0xff]  }
 0x4bd   :  { %v3265_v53 = vpop.permute.xlu0 %3264 }
 0x4be   :  { %v3267_v58 = vunpack.i.h.bf16 %v3265_v53  ;;  %v3266_v0 = vunpack.i.l.bf16 %v3265_v53  ;;  %3091 = vmatpush3.bf16.msra.mxu1 %v543_v52 }
 0x4bf   :  { %v3474_v2 = vpop.eup %3473  ;;  %3102 = vmatprep.subr.bf16.mxu1 %v3669_v62 }
 0x4c0   :  { %v542_v4 = vpack.c.bf16 %v3267_v58, %v3266_v0  ;;  %v830_v7 = vmul.f32 %v3474_v2, %v3458_v23  ;;  %v1325_v58 = vsel %vm545_vm1, %v1293_v48, 0 }
 0x4c1   :  { %v3285_v49 = vpop.permute.xlu0 %3284 }
 0x4c2   :  { %3085 = vmatpush3.bf16.msra.mxu0 %v542_v4  ;;  %v836_v10 = vpack.c.bf16 %v830_v7, %v829_v5  ;;  %v3287_v53 = vunpack.i.h.bf16 %v3285_v49  ;;  %v3286_v56 = vunpack.i.l.bf16 %v3285_v49 }
 0x4c3   :  { %v3476_v9 = vpop.eup %3475  ;;  %3096 = vmatprep.subr.bf16.mxu0 %v3669_v62 }
 0x4c4   :  { %v3478_v11 = vpop.eup %3477  ;;  %v831_v12 = vmul.f32 %v3476_v9, %v3891_v26  ;;  %v1295_v19 = vpack.c.bf16 %v3287_v53, %v3286_v56 }
 0x4c5   :  { %3087 = vmatmul.mubr.msk.bf16.vlgmr.msra.gmra.mxu0 %vm746_vm3, %v836_v10  ;;  %v832_v13 = vmul.f32 %v3478_v11, %v3889_v25  ;;  %v3295_v11 = vpop.permute.xlu0 %3294 }
 0x4c6   :  { %3098 = vmatprep.mubr.msk.bf16.mxu0 %vm3670_vm0, %v3669_v62  ;;  %v1419_v2 = vsel %vm545_vm1, %v1295_v19, 0 }
 0x4c7   :  { %v837_v16 = vpack.c.bf16 %v832_v13, %v831_v12  ;;  %v3480_v24 = vpop.eup %3479 }
 0x4c8   :  { %v833_v26 = vmul.f32 %v3480_v24, %v3897_v30 }
 0x4c9   :  { %3093 = vmatmul.mubr.msk.bf16.vlgmr.msra.gmra.mxu1 %vm746_vm3, %v837_v16 }
 0x4ca   :  { %3103 = vmatpush3.bf16.msra.mxu1 %v3931_v15  ;;  %3106 = vmatprep.mubr.msk.bf16.mxu1 %vm3670_vm0, %v3669_v62 }
 0x4cb   :  { %3104 = vmatprep.subr.bf16.mxu1 %v3669_v62 }
 0x4ce   :  { %3105 = vmatpush3.bf16.msra.mxu1 %v3935_v17 }
 0x4cf   :  { %3118 = vmatprep.subr.bf16.mxu1 %v3669_v62 }
 0x4ea   :  { %v818_v18 = vpop.xlane.xlu1 %817 }
 0x4eb   :  { %3481 = vrcp.f32 %v818_v18  ;;  %v3297_v18 = vunpack.i.h.bf16 %v3295_v11 }
 0x4ee   :  { %v3275_v20 = vpop.permute.xlu1 %3274 }
 0x4ef   :  { %v3277_v21 = vunpack.i.h.bf16 %v3275_v20  ;;  %v3276_v22 = vunpack.i.l.bf16 %v3275_v20  ;;  %v3296_v20 = vunpack.i.l.bf16 %v3295_v11 }
 0x4f1   :  { %v544_v23 = vpack.c.bf16 %v3277_v21, %v3276_v22  ;;  %v1296_v21 = vpack.c.bf16 %v3297_v18, %v3296_v20 }
 0x4f2   :  { %v3280_v45 = vpop.permute.xlu1 %3279 }
 0x4f3   :  { %3097 = vmatpush3.bf16.msra.mxu0 %v544_v23  ;;  %v3282_v57 = vunpack.i.h.bf16 %v3280_v45  ;;  %v3281_v60 = vunpack.i.l.bf16 %v3280_v45  ;;  %v3305_v23 = vpop.permute.xlu0 %3304  ;;  %v1466_v24 = vsel %vm545_vm1, %v1296_v21, 0 }
 0x4f4   :  { %3110 = vmatprep.subr.bf16.mxu0 %v3669_v62 }
 0x4f5   :  { %v1294_v10 = vpack.c.bf16 %v3282_v57, %v3281_v60 }
 0x4f6   :  { %v3290_v55 = vpop.permute.xlu1 %3289 }
 0x4f7   :  { %v1372_v54 = vsel %vm545_vm1, %v1294_v10, 0  ;;  %v3292_v59 = vunpack.i.h.bf16 %v3290_v55 }
 0x4f8   :  { %v3482_v25 = vpop.eup %3481 }
 0x4f9   :  { %v834_v27 = vmul.f32 %v3482_v25, %v3470_v44  ;;  %v3966_v44 = vld [vmem:[#allocation7 + $0x38] sm:$0xff]   ;;  %v3307_v25 = vunpack.i.h.bf16 %v3305_v23 }
 0x4fa   :  { %v3300_v0 = vpop.permute.xlu1 %3299 }
 0x4fb   :  { %v838_v29 = vpack.c.bf16 %v834_v27, %v833_v26  ;;  %v3302_v4 = vunpack.i.h.bf16 %v3300_v0  ;;  %v3301_v5 = vunpack.i.l.bf16 %v3300_v0  ;;  %v3306_v26 = vunpack.i.l.bf16 %v3305_v23 }
 0x4fd   :  { %3099 = vmatmul.mubr.msk.bf16.vlgmr.msra.gmra.mxu0 %vm746_vm3, %v838_v29  ;;  %v1271_v7 = vpack.c.bf16 %v3302_v4, %v3301_v5  ;;  %v1272_v27 = vpack.c.bf16 %v3307_v25, %v3306_v26 }
 0x4fe   :  { %3114 = vmatprep.mubr.msk.bf16.mxu0 %vm3670_vm0, %v3669_v62  ;;  %3111 = vmatpush3.bf16.msra.mxu0 %v3947_v31 }
 0x4ff   :  { %3112 = vmatprep.subr.bf16.mxu0 %v3669_v62 }
 0x502   :  { %3113 = vmatpush3.bf16.msra.mxu0 %v3951_v32 }
 0x503   :  { %3126 = vmatprep.subr.bf16.mxu0 %v3669_v62 }
 0x50d   :  { %v876_v30 = vpop.f32.mrf.mxu1 }
 0x50f   :  { %v3082_v33 = vpop.f32.mrf.mxu1 }
 0x511   :  { %v879_v34 = vpop.f32.mrf.mxu1 }
 0x512   :  { %v1015_v36 = vpack.c.bf16 %v879_v34, %v876_v30 }
 0x513   :  { %v3083_v37 = vpop.f32.mrf.mxu1 }
 0x514   :  { %3107 = vmatmul.mubr.msk.bf16.vlgmr.msra.gmra.mxu1 %vm545_vm1, %v1015_v36 }
 0x515   :  { %3119 = vmatpush3.bf16.msra.mxu1 %v3955_v35  ;;  %3122 = vmatprep.mubr.msk.bf16.mxu1 %vm3670_vm0, %v3669_v62 }
 0x516   :  { %3120 = vmatprep.subr.bf16.mxu1 %v3669_v62 }
 0x519   :  { %3121 = vmatpush3.bf16.msra.mxu1 %v3959_v38 }
 0x51a   :  { %3134 = vmatprep.subr.bf16.mxu1 %v3669_v62 }
 0x585   :  { %v920_v39 = vpop.f32.mrf.mxu0 }
 0x587   :  { %v3088_v40 = vpop.f32.mrf.mxu0 }
 0x589   :  { %v964_v42 = vpop.f32.mrf.mxu1  ;;  %v923_v43 = vpop.f32.mrf.mxu0 }
 0x58a   :  { %v1016_v41 = vpack.c.bf16 %v923_v43, %v920_v39 }
 0x58b   :  { %v3094_v46 = vpop.f32.mrf.mxu1  ;;  %v3089_v47 = vpop.f32.mrf.mxu0 }
 0x58c   :  { %3115 = vmatmul.mubr.msk.bf16.vlgmr.msra.gmra.mxu0 %vm545_vm1, %v1016_v41 }
 0x58d   :  { %v967_v50 = vpop.f32.mrf.mxu1  ;;  %3127 = vmatpush3.bf16.msra.mxu0 %v3966_v44  ;;  %3130 = vmatprep.mubr.msk.bf16.mxu0 %vm3670_vm0, %v3669_v62 }
 0x58e   :  { %v1017_v51 = vpack.c.bf16 %v967_v50, %v964_v42  ;;  %3128 = vmatprep.subr.bf16.mxu0 %v3669_v62 }
 0x58f   :  { %v3095_v52 = vpop.f32.mrf.mxu1 }
 0x590   :  { %3123 = vmatmul.mubr.msk.bf16.vlgmr.msra.gmra.mxu1 %vm545_vm1, %v1017_v51 }
 0x591   :  { %3135 = vmatpush3.bf16.xpose.msra.mxu1 %v1325_v58  ;;  %3136 = vmatprep.mubr.msk.bf16.mxu1 %vm3670_vm0, %v3669_v62 }
 0x592   :  { %3146 = vmatprep.subr.bf16.mxu1 %v3669_v62  ;;  %3129 = vmatpush3.bf16.msra.mxu0 %v3975_v3 }
 0x593   :  { %3140 = vmatprep.subr.bf16.mxu0 %v3669_v62 }
 0x598   :  { %3137 = vmatmul.mubr.msk.bf16.vlgmr.msra.gmra.mxu1 %vm545_vm1, %v1269_v1 }
 0x599   :  { %3147 = vmatpush3.bf16.xpose.msra.mxu1 %v1419_v2  ;;  %3148 = vmatprep.mubr.msk.bf16.mxu1 %vm3670_vm0, %v3669_v62 }
 0x59a   :  { %3158 = vmatprep.subr.bf16.mxu1 %v3669_v62 }
 0x5a0   :  { %3149 = vmatmul.mubr.msk.bf16.vlgmr.msra.gmra.mxu1 %vm545_vm1, %v1271_v7 }
 0x5a1   :  { %3159 = vmatpush3.bf16.msra.mxu1 %v1317_v61  ;;  %3160 = vmatprep.mubr.msk.bf16.mxu1 %vm3670_vm0, %v3669_v62  ;;  %v3291_v61 = vunpack.i.l.bf16 %v3290_v55 }
 0x5a2   :  { %3170 = vmatprep.subr.bf16.mxu1 %v3669_v62 }
 0x5a3   :  { %v1270_v22 = vpack.c.bf16 %v3292_v59, %v3291_v61 }
 0x5bd   :  { %v1008_v1 = vpop.f32.mrf.mxu0 }
 0x5bf   :  { %v3100_v9 = vpop.f32.mrf.mxu0 }
 0x5c1   :  { %v1011_v12 = vpop.f32.mrf.mxu0 }
 0x5c2   :  { %v1018_v13 = vpack.c.bf16 %v1011_v12, %v1008_v1 }
 0x5c3   :  { %v3101_v16 = vpop.f32.mrf.mxu0 }
 0x5c4   :  { %3131 = vmatmul.mubr.msk.bf16.vlgmr.msra.gmra.mxu0 %vm545_vm1, %v1018_v13 }
 0x5c5   :  { %3141 = vmatpush3.bf16.xpose.msra.mxu0 %v1372_v54  ;;  %3142 = vmatprep.mubr.msk.bf16.mxu0 %vm3670_vm0, %v3669_v62 }
 0x5c6   :  { %3152 = vmatprep.subr.bf16.mxu0 %v3669_v62 }
 0x5cc   :  { %3143 = vmatmul.mubr.msk.bf16.vlgmr.msra.gmra.mxu0 %vm545_vm1, %v1270_v22 }
 0x5cd   :  { %3153 = vmatpush3.bf16.xpose.msra.mxu0 %v1466_v24  ;;  %3154 = vmatprep.mubr.msk.bf16.mxu0 %vm3670_vm0, %v3669_v62 }
 0x5ce   :  { %3164 = vmatprep.subr.bf16.mxu0 %v3669_v62 }
 0x5d4   :  { %v1068_v29 = vpop.f32.mrf.mxu1  ;;  %3155 = vmatmul.mubr.msk.bf16.vlgmr.msra.gmra.mxu0 %vm545_vm1, %v1272_v27 }
 0x5d5   :  { %3166 = vmatprep.mubr.msk.bf16.mxu0 %vm3670_vm0, %v3669_v62 }
 0x5d6   :  { %v3108_v30 = vpop.f32.mrf.mxu1 }
 0x5d8   :  { %v1071_v33 = vpop.f32.mrf.mxu1 }
 0x5da   :  { %v3109_v34 = vpop.f32.mrf.mxu1 }
 0x64c   :  { %v1124_v36 = vpop.f32.mrf.mxu0 }
 0x64d   :  { %v1243_v37 = vadd.f32 %v1124_v36, %v1068_v29 }
 0x64e   :  { %v3116_v39 = vpop.f32.mrf.mxu0 }
 0x650   :  { %v1180_v40 = vpop.f32.mrf.mxu1  ;;  %v1127_v42 = vpop.f32.mrf.mxu0 }
 0x651   :  { %v1244_v43 = vadd.f32 %v1243_v37, %v1180_v40  ;;  %v1246_v45 = vadd.f32 %v1127_v42, %v1071_v33 }
 0x652   :  { %v3124_v41 = vpop.f32.mrf.mxu1  ;;  %v3117_v46 = vpop.f32.mrf.mxu0 }
 0x654   :  { %v1183_v47 = vpop.f32.mrf.mxu1 }
 0x655   :  { %v1247_v48 = vadd.f32 %v1246_v45, %v1183_v47 }
 0x656   :  { %v3125_v49 = vpop.f32.mrf.mxu1 }
 0x658   :  { %v1361_v50 = vpop.f32.mrf.mxu1 }
 0x659   :  { %v1509_v51 = vsel %vm3844_vm2, %v1361_v50, -1e+30 }
 0x65a   :  { %v3138_v52 = vpop.f32.mrf.mxu1  ;;  %v1517_v53 = vsel %vm746_vm3, %v1509_v51, -inf }
 0x65b   :  { %1518 = vmax.xlane.f32.xlu1 %v1517_v53 }
 0x65c   :  { %v1364_v56 = vpop.f32.mrf.mxu1 }
 0x65d   :  { %v1510_v58 = vsel %vm3852_vm4, %v1364_v56, -1e+30 }
 0x65e   :  { %v3139_v55 = vpop.f32.mrf.mxu1  ;;  %v1520_v19 = vsel %vm746_vm3, %v1510_v58, -inf }
 0x65f   :  { %1521 = vmax.xlane.f32.xlu0 %v1520_v19 }
 0x660   :  { %v1455_v0 = vpop.f32.mrf.mxu1 }
 0x661   :  { %v1513_v2 = vsel %vm3844_vm2, %v1455_v0, -1e+30 }
 0x662   :  { %v3150_v4 = vpop.f32.mrf.mxu1  ;;  %v1529_v5 = vsel %vm746_vm3, %v1513_v2, -inf }
 0x663   :  { %1530 = vmax.xlane.f32.xlu1 %v1529_v5 }
 0x664   :  { %v1458_v7 = vpop.f32.mrf.mxu1 }
 0x665   :  { %v1514_v22 = vsel %vm3852_vm4, %v1458_v7, -1e+30 }
 0x666   :  { %v3151_v57 = vpop.f32.mrf.mxu1  ;;  %v1532_v26 = vsel %vm746_vm3, %v1514_v22, -inf }
 0x684   :  { %v1236_v60 = vpop.f32.mrf.mxu0 }
 0x685   :  { %v4021_v1 = vadd.f32 %v1244_v43, %v1236_v60 }
 0x686   :  { %v3132_v9 = vpop.f32.mrf.mxu0 }
 0x688   :  { %v1239_v10 = vpop.f32.mrf.mxu0 }
 0x689   :  { %v4023_v11 = vadd.f32 %v1247_v48, %v1239_v10 }
 0x68a   :  { %v3133_v12 = vpop.f32.mrf.mxu0 }
 0x68c   :  { %v1408_v13 = vpop.f32.mrf.mxu0 }
 0x68d   :  { %v1511_v16 = vsel %vm3844_vm2, %v1408_v13, -1e+30 }
 0x68e   :  { %v3144_v18 = vpop.f32.mrf.mxu0  ;;  %v1523_v20 = vsel %vm746_vm3, %v1511_v16, -inf }
 0x68f   :  { %1524 = vmax.xlane.f32.xlu0 %v1523_v20 }
 0x690   :  { %v1411_v54 = vpop.f32.mrf.mxu0 }
 0x691   :  { %v1512_v59 = vsel %vm3852_vm4, %v1411_v54, -1e+30 }
 0x692   :  { %v3145_v61 = vpop.f32.mrf.mxu0  ;;  %v1526_v21 = vsel %vm746_vm3, %v1512_v59, -inf }
 0x693   :  { %1527 = vmax.xlane.f32.xlu0 %v1526_v21 }
 0x694   :  { %v1502_v23 = vpop.f32.mrf.mxu0 }
 0x695   :  { %v1515_v24 = vsel %vm3844_vm2, %v1502_v23, -1e+30 }
 0x696   :  { %v3156_v25 = vpop.f32.mrf.mxu0  ;;  %v1535_v27 = vsel %vm746_vm3, %v1515_v24, -inf }
 0x697   :  { %1533 = vmax.xlane.f32.xlu0 %v1532_v26  ;;  %1536 = vmax.xlane.f32.xlu1 %v1535_v27  ;;  %v3523_v26 = vld [vmem:[#allocation2] sm:$0xff] }
 0x698   :  { %v1505_v29 = vpop.f32.mrf.mxu0  ;;  %v1971_v27 = vadd.f32 %v3523_v26, %v4021_v1 }
 0x699   :  { %v1516_v30 = vsel %vm3852_vm4, %v1505_v29, -1e+30  ;;  %v4077_v29 = vld [vmem:[%s4209_s5] ss:$0 sm:$0xff] }
 0x69a   :  { %v3157_v33 = vpop.f32.mrf.mxu0  ;;  %v1538_v34 = vsel %vm746_vm3, %v1516_v30, -inf }
 0x69b   :  { %1539 = vmax.xlane.f32.xlu0 %v1538_v34  ;;  %v4081_v34 = vadd.f32 %v4077_v29, %v1971_v27 }
 0x6a8   :  { %3309 = vrot.lane.b32.xlu1 %v3830_v63, %s3671_s1 }
 0x6e4   :  { %v1519_v8 = vpop.xlane.xlu1 %1518 }
 0x6e5   :  { %v1541_v36 = vsub.f32 %v1509_v51, %v1519_v8 }
 0x6e7   :  { %v1549_v37 = vmul.f32 1.442695, %v1541_v36 }
 0x6e8   :  { %v1522_v39 = vpop.xlane.xlu0 %1521 }
 0x6e9   :  { %3483 = vpow2.f32 %v1549_v37  ;;  %v1542_v40 = vsub.f32 %v1510_v58, %v1522_v39 }
 0x6eb   :  { %v1551_v42 = vmul.f32 1.442695, %v1542_v40 }
 0x6ec   :  { %v1531_v46 = vpop.xlane.xlu1 %1530 }
 0x6ed   :  { %3485 = vpow2.f32 %v1551_v42  ;;  %v1545_v47 = vsub.f32 %v1513_v2, %v1531_v46 }
 0x6ef   :  { %v1557_v50 = vmul.f32 1.442695, %v1545_v47 }
 0x6f6   :  { %v4042_v43 = vpop.eup %3483 }
 0x6f7   :  { %v1565_v14 = vsel %vm746_vm3, %v4042_v43, 0.0 }
 0x6f8   :  { %1566 = vadd.xlane.f32.xlu1 %v1565_v14 }
 0x6fa   :  { %v4046_v45 = vpop.eup %3485 }
 0x6fb   :  { %v1568_v41 = vsel %vm746_vm3, %v4046_v45, 0.0 }
 0x6fc   :  { %1569 = vadd.xlane.f32.xlu0 %v1568_v41 }
 0x718   :  { %v1525_v48 = vpop.xlane.xlu0 %1524 }
 0x719   :  { %v1543_v49 = vsub.f32 %v1511_v16, %v1525_v48 }
 0x71b   :  { %v1553_v51 = vmul.f32 1.442695, %v1543_v49 }
 0x71c   :  { %v1528_v52 = vpop.xlane.xlu0 %1527 }
 0x71d   :  { %3487 = vpow2.f32 %v1553_v51  ;;  %v1544_v53 = vsub.f32 %v1512_v59, %v1528_v52 }
 0x71e   :  { %3489 = vpow2.f32 %v1557_v50 }
 0x71f   :  { %v1555_v56 = vmul.f32 1.442695, %v1544_v53 }
 0x720   :  { %v1534_v58 = vpop.xlane.xlu0 %1533  ;;  %v1537_v55 = vpop.xlane.xlu1 %1536 }
 0x721   :  { %3491 = vpow2.f32 %v1555_v56  ;;  %v1546_v19 = vsub.f32 %v1514_v22, %v1534_v58  ;;  %v1547_v0 = vsub.f32 %v1515_v24, %v1537_v55 }
 0x723   :  { %v1559_v4 = vmul.f32 1.442695, %v1546_v19  ;;  %v1561_v5 = vmul.f32 1.442695, %v1547_v0 }
 0x724   :  { %v3310_v7 = vpop.permute.xlu1 %3309  ;;  %v1540_v57 = vpop.xlane.xlu0 %1539 }
 0x725   :  { %3493 = vpow2.f32 %v1559_v4  ;;  %v3312_v2 = vunpack.i.h.bf16 %v3310_v7  ;;  %v3311_v60 = vunpack.i.l.bf16 %v3310_v7  ;;  %v1548_v9 = vsub.f32 %v1516_v30, %v1540_v57  ;;  %v3524_v30 = vld [vmem:[#allocation2 + $0x8] sm:$0xff] }
 0x726   :  { %3495 = vpow2.f32 %v1561_v5  ;;  %v1972_v33 = vadd.f32 %v3524_v30, %v4023_v11 }
 0x727   :  { %v1318_v10 = vpack.c.bf16 %v3312_v2, %v3311_v60  ;;  %v1563_v12 = vmul.f32 1.442695, %v1548_v9 }
 0x728   :  { %v4085_v8 = vadd.f32 %v4077_v29, %v1972_v33 }
 0x729   :  { %3497 = vpow2.f32 %v1563_v12  ;;  %3165 = vmatpush3.bf16.msra.mxu0 %v1318_v10 }
 0x72a   :  { %v4050_v13 = vpop.eup %3487  ;;  %3176 = vmatprep.subr.bf16.mxu0 %v3669_v62 }
 0x72b   :  { %v1571_v16 = vsel %vm746_vm3, %v4050_v13, 0.0  ;;  %v4055_v18 = vpop.eup %3489 }
 0x72c   :  { %1572 = vadd.xlane.f32.xlu1 %v1571_v16  ;;  %v1577_v54 = vsel %vm746_vm3, %v4055_v18, 0.0 }
 0x72e   :  { %v3492_v20 = vpop.eup %3491 }
 0x72f   :  { %v1574_v59 = vsel %vm746_vm3, %v3492_v20, 0.0 }
 0x730   :  { %1578 = vadd.xlane.f32.xlu1 %v1577_v54  ;;  %1575 = vadd.xlane.f32.xlu0 %v1574_v59 }
 0x732   :  { %v3494_v61 = vpop.eup %3493 }
 0x733   :  { %v4060_v21 = vpop.eup %3495  ;;  %v1580_v22 = vsel %vm746_vm3, %v3494_v61, 0.0 }
 0x734   :  { %v1583_v23 = vsel %vm746_vm3, %v4060_v21, 0.0  ;;  %1581 = vadd.xlane.f32.xlu0 %v1580_v22 }
 0x735   :  { %1584 = vadd.xlane.f32.xlu1 %v1583_v23 }
 0x736   :  { %v4065_v24 = vpop.eup %3497 }
 0x737   :  { %v1586_v25 = vsel %vm746_vm3, %v4065_v24, 0.0 }
 0x738   :  { %1587 = vadd.xlane.f32.xlu0 %v1586_v25 }
 0x746   :  { %3319 = vrot.lane.b32.xlu1 %v3830_v63, %s3672_s2 }
 0x74e   :  { %3314 = vrot.lane.b32.xlu0 %v3830_v63, %s3665_s25 }
 0x76a   :  { %1988 = vadd.xlane.f32.xlu1 %v4081_v34 }
 0x76d   :  { %1990 = vadd.xlane.f32.xlu0 %v4085_v8 }
 0x781   :  { %v1567_v63 = vpop.xlane.xlu1 %1566 }
 0x782   :  { %3499 = vrcp.f32 %v1567_v63 }
 0x785   :  { %v1570_v1 = vpop.xlane.xlu0 %1569 }
 0x786   :  { %3501 = vrcp.f32 %v1570_v1 }
 0x78f   :  { %v3500_v36 = vpop.eup %3499 }
 0x790   :  { %v1597_v39 = vmul.f32 %v3500_v36, %v4042_v43 }
 0x793   :  { %v3502_v37 = vpop.eup %3501 }
 0x794   :  { %v1598_v11 = vmul.f32 %v3502_v37, %v4046_v45 }
 0x796   :  { %v1605_v40 = vpack.c.bf16 %v1598_v11, %v1597_v39 }
 0x798   :  { %3161 = vmatmul.mubr.msk.bf16.vlgmr.msra.gmra.mxu1 %vm746_vm3, %v1605_v40 }
 0x799   :  { %3172 = vmatprep.mubr.msk.bf16.mxu1 %vm3670_vm0, %v3669_v62 }
 0x7b5   :  { %v1573_v42 = vpop.xlane.xlu1 %1572 }
 0x7b6   :  { %3503 = vrcp.f32 %v1573_v42 }
 0x7b9   :  { %v1579_v14 = vpop.xlane.xlu1 %1578  ;;  %v1576_v41 = vpop.xlane.xlu0 %1575 }
 0x7ba   :  { %3505 = vrcp.f32 %v1576_v41 }
 0x7bb   :  { %3507 = vrcp.f32 %v1579_v14 }
 0x7bd   :  { %v1582_v46 = vpop.xlane.xlu0 %1581 }
 0x7be   :  { %v1585_v47 = vpop.xlane.xlu1 %1584  ;;  %3509 = vrcp.f32 %v1582_v46 }
 0x7bf   :  { %3511 = vrcp.f32 %v1585_v47 }
 0x7c1   :  { %v1588_v48 = vpop.xlane.xlu0 %1587 }
 0x7c2   :  { %3513 = vrcp.f32 %v1588_v48  ;;  %v3320_v43 = vpop.permute.xlu1 %3319 }
 0x7c3   :  { %v3504_v49 = vpop.eup %3503  ;;  %v3322_v53 = vunpack.i.h.bf16 %v3320_v43  ;;  %v3321_v56 = vunpack.i.l.bf16 %v3320_v43 }
 0x7c4   :  { %v1599_v19 = vmul.f32 %v3504_v49, %v4050_v13 }
 0x7c5   :  { %v3315_v45 = vpop.permute.xlu0 %3314  ;;  %v1320_v7 = vpack.c.bf16 %v3322_v53, %v3321_v56  ;;  %v3525_v53 = vld [vmem:[#allocation2 + $0x10] sm:$0xff] }
 0x7c6   :  { %v3317_v50 = vunpack.i.h.bf16 %v3315_v45  ;;  %v3316_v51 = vunpack.i.l.bf16 %v3315_v45 }
 0x7c7   :  { %v3506_v52 = vpop.eup %3505 }
 0x7c8   :  { %v1319_v58 = vpack.c.bf16 %v3317_v50, %v3316_v51  ;;  %v3508_v55 = vpop.eup %3507  ;;  %v1600_v0 = vmul.f32 %v3506_v52, %v3492_v20 }
 0x7c9   :  { %v1601_v57 = vmul.f32 %v3508_v55, %v4055_v18 }
 0x7ca   :  { %3171 = vmatpush3.bf16.msra.mxu1 %v1319_v58  ;;  %v1606_v5 = vpack.c.bf16 %v1600_v0, %v1599_v19 }
 0x7cb   :  { %v3510_v4 = vpop.eup %3509  ;;  %3182 = vmatprep.subr.bf16.mxu1 %v3669_v62 }
 0x7cc   :  { %v1602_v2 = vmul.f32 %v3510_v4, %v3494_v61  ;;  %v3512_v60 = vpop.eup %3511  ;;  %3167 = vmatmul.mubr.msk.bf16.vlgmr.msra.gmra.mxu0 %vm746_vm3, %v1606_v5 }
 0x7cd   :  { %3177 = vmatpush3.bf16.msra.mxu0 %v1320_v7  ;;  %3178 = vmatprep.mubr.msk.bf16.mxu0 %vm3670_vm0, %v3669_v62  ;;  %v1603_v12 = vmul.f32 %v3512_v60, %v4060_v21  ;;  %v3526_v7 = vld [vmem:[#allocation2 + $0x18] sm:$0xff] }
 0x7ce   :  { %v1607_v9 = vpack.c.bf16 %v1602_v2, %v1601_v57  ;;  %3190 = vmatprep.subr.bf16.mxu0 %v3669_v62 }
 0x7cf   :  { %v3514_v10 = vpop.eup %3513 }
 0x7d0   :  { %3173 = vmatmul.mubr.msk.bf16.vlgmr.msra.gmra.mxu1 %vm746_vm3, %v1607_v9  ;;  %v1604_v13 = vmul.f32 %v3514_v10, %v4065_v24 }
 0x7d1   :  { %3183 = vmatpush3.bf16.msra.mxu1 %v3931_v15  ;;  %3186 = vmatprep.mubr.msk.bf16.mxu1 %vm3670_vm0, %v3669_v62 }
 0x7d2   :  { %v1608_v16 = vpack.c.bf16 %v1604_v13, %v1603_v12  ;;  %3184 = vmatprep.subr.bf16.mxu1 %v3669_v62  ;;  %v3365_v12 = vld [vmem:[#allocation8 + $0xe4] ss:$16 sps:$4 sm:$0xff]   ;;  %v3368_v13 = vld [vmem:[#allocation8 + $0xec] ss:$16 sps:$4 sm:$0xff]  }
 0x7d4   :  { %3179 = vmatmul.mubr.msk.bf16.vlgmr.msra.gmra.mxu0 %vm746_vm3, %v1608_v16  ;;  %v3363_v16 = vld [vmem:[#allocation8 + $0xe0] ss:$16 sps:$4 sm:$0xff]  }
 0x7d5   :  { %3185 = vmatpush3.bf16.msra.mxu1 %v3935_v17  ;;  %3191 = vmatpush3.bf16.msra.mxu0 %v3947_v31 }
 0x7d6   :  { %3198 = vmatprep.subr.bf16.mxu1 %v3669_v62  ;;  %3192 = vmatprep.subr.bf16.mxu0 %v3669_v62 }
 0x7d7   :  { %3194 = vmatprep.mubr.msk.bf16.mxu0 %vm3670_vm0, %v3669_v62 }
 0x7d9   :  { %3193 = vmatpush3.bf16.msra.mxu0 %v3951_v32 }
 0x7da   :  { %3206 = vmatprep.subr.bf16.mxu0 %v3669_v62 }
 0x7f3   :  { %v1989_v14 = vpop.xlane.xlu1 %1988 }
 0x7f4   :  { %v1996_v48 = vmul.f32 0.0078125, %v1989_v14 }
 0x7f6   :  { %v1991_v50 = vpop.xlane.xlu0 %1990  ;;  %v4133_v55 = vsub.f32 %v4081_v34, %v1996_v48 }
 0x7f7   :  { %v1997_v19 = vmul.f32 0.0078125, %v1991_v50 }
 0x7f8   :  { %v2004_v60 = vmul.f32 %v4133_v55, %v4133_v55 }
 0x7f9   :  { %v4140_v2 = vsub.f32 %v4085_v8, %v1997_v19 }
 0x7fb   :  { %v2005_v10 = vmul.f32 %v4140_v2, %v4140_v2 }
 0x858   :  { %v1646_v15 = vpop.f32.mrf.mxu1 }
 0x85a   :  { %v3162_v18 = vpop.f32.mrf.mxu1 }
 0x85b   :  { %v3371_v18 = vld [vmem:[#allocation8 + $0xc4] ss:$16 sps:$4 sm:$0xff]  }
 0x85c   :  { %v1649_v20 = vpop.f32.mrf.mxu1 }
 0x85d   :  { %v1785_v54 = vpack.c.bf16 %v1649_v20, %v1646_v15  ;;  %v3366_v15 = vld [vmem:[#allocation8 + $0xe8] ss:$16 sps:$4 sm:$0xff]   ;;  %v3374_v20 = vld [vmem:[#allocation8 + $0xcc] ss:$16 sps:$4 sm:$0xff]  }
 0x85e   :  { %v3163_v59 = vpop.f32.mrf.mxu1 }
 0x85f   :  { %3187 = vmatmul.mubr.msk.bf16.vlgmr.msra.gmra.mxu1 %vm545_vm1, %v1785_v54  ;;  %v3369_v54 = vld [vmem:[#allocation8 + $0xc0] ss:$16 sps:$4 sm:$0xff]   ;;  %v3377_v59 = vld [vmem:[#allocation8 + $0xa4] ss:$16 sps:$4 sm:$0xff]  }
 0x860   :  { %3199 = vmatpush3.bf16.msra.mxu1 %v3955_v35  ;;  %3202 = vmatprep.mubr.msk.bf16.mxu1 %vm3670_vm0, %v3669_v62 }
 0x861   :  { %3200 = vmatprep.subr.bf16.mxu1 %v3669_v62 }
 0x864   :  { %3201 = vmatpush3.bf16.msra.mxu1 %v3959_v38 }
 0x865   :  { %2268 = vmatprep.subr.bf16.mxu1 %v3365_v12  ;;  %v3412_v12 = vld [vmem:[#allocation10 + $0xf8] sm:$0xff]  }
 0x88c   :  { %v1690_v17 = vpop.f32.mrf.mxu0 }
 0x88e   :  { %v3168_v31 = vpop.f32.mrf.mxu0 }
 0x88f   :  { %v3375_v31 = vld [vmem:[#allocation8 + $0xa0] ss:$16 sps:$4 sm:$0xff]  }
 0x890   :  { %v1734_v32 = vpop.f32.mrf.mxu1  ;;  %v1693_v61 = vpop.f32.mrf.mxu0 }
 0x891   :  { %v1786_v21 = vpack.c.bf16 %v1693_v61, %v1690_v17  ;;  %v3380_v17 = vld [vmem:[#allocation8 + $0xac] ss:$16 sps:$4 sm:$0xff]   ;;  %v3381_v61 = vld [vmem:[#allocation8 + $0x80] ss:$16 sps:$4 sm:$0xff]  }
 0x892   :  { %v3174_v22 = vpop.f32.mrf.mxu1  ;;  %v3169_v23 = vpop.f32.mrf.mxu0 }
 0x893   :  { %3195 = vmatmul.mubr.msk.bf16.vlgmr.msra.gmra.mxu0 %vm545_vm1, %v1786_v21  ;;  %v3383_v21 = vld [vmem:[#allocation8 + $0x84] ss:$16 sps:$4 sm:$0xff]   ;;  %v3384_v22 = vld [vmem:[#allocation8 + $0x88] ss:$16 sps:$4 sm:$0xff]   ;;  %v3386_v23 = vld [vmem:[#allocation8 + $0x8c] ss:$16 sps:$4 sm:$0xff]  }
 0x894   :  { %v1737_v24 = vpop.f32.mrf.mxu1  ;;  %v1778_v26 = vpop.f32.mrf.mxu0  ;;  %3207 = vmatpush3.bf16.msra.mxu0 %v3966_v44  ;;  %3210 = vmatprep.mubr.msk.bf16.mxu0 %vm3670_vm0, %v3669_v62 }
 0x895   :  { %v1787_v25 = vpack.c.bf16 %v1737_v24, %v1734_v32  ;;  %3208 = vmatprep.subr.bf16.mxu0 %v3669_v62  ;;  %v3378_v32 = vld [vmem:[#allocation8 + $0xa8] ss:$16 sps:$4 sm:$0xff]   ;;  %v3389_v24 = vld [vmem:[#allocation8 + $0x64] ss:$16 sps:$4 sm:$0xff]  }
 0x896   :  { %v3175_v35 = vpop.f32.mrf.mxu1  ;;  %v3180_v38 = vpop.f32.mrf.mxu0 }
 0x897   :  { %3203 = vmatmul.mubr.msk.bf16.vlgmr.msra.gmra.mxu1 %vm545_vm1, %v1787_v25  ;;  %v3392_v25 = vld [vmem:[#allocation8 + $0x6c] ss:$16 sps:$4 sm:$0xff]   ;;  %v3390_v35 = vld [vmem:[#allocation8 + $0x68] ss:$16 sps:$4 sm:$0xff]   ;;  %v3395_v38 = vld [vmem:[#allocation8 + $0x44] ss:$16 sps:$4 sm:$0xff]  }
 0x898   :  { %2300 = vmatprep.mubr.bf16.mxu1 %v3668_v28  ;;  %v1781_v27 = vpop.f32.mrf.mxu0  ;;  %3209 = vmatpush3.bf16.msra.mxu0 %v3975_v3 }
 0x899   :  { %v1788_v30 = vpack.c.bf16 %v1781_v27, %v1778_v26  ;;  %2321 = vmatprep.subr.bf16.mxu0 %v3368_v13  ;;  %2269 = vmatpush1.bf16.msra.mxu1 %v3363_v16  ;;  %v3387_v26 = vld [vmem:[#allocation8 + $0x60] ss:$16 sps:$4 sm:$0xff]   ;;  %v3398_v27 = vld [vmem:[#allocation8 + $0x4c] ss:$16 sps:$4 sm:$0xff]  }
 0x89a   :  { %v3181_v33 = vpop.f32.mrf.mxu0  ;;  %2270 = vmatprep.subr.bf16.mxu1 %v3371_v18  ;;  %v3413_v13 = vld [vmem:[#allocation10 + $0x38] sm:$0xff]   ;;  %v3416_v18 = vld [vmem:[#allocation10 + $0xf0] sm:$0xff]  }
 0x89b   :  { %3211 = vmatmul.mubr.msk.bf16.vlgmr.msra.gmra.mxu0 %vm545_vm1, %v1788_v30  ;;  %v3393_v30 = vld [vmem:[#allocation8 + $0x40] ss:$16 sps:$4 sm:$0xff]   ;;  %v3396_v33 = vld [vmem:[#allocation8 + $0x48] ss:$16 sps:$4 sm:$0xff]  }
 0x89c   :  { %2353 = vmatprep.mubr.bf16.mxu0 %v3668_v28  ;;  %2322 = vmatpush1.bf16.msra.mxu0 %v3366_v15  ;;  %v3414_v16 = vld [vmem:[#allocation10 + $0xb8] sm:$0xff]   ;;  %v3415_v15 = vld [vmem:[#allocation10 + $0x70] sm:$0xff]  }
 0x89d   :  { %2323 = vmatprep.subr.bf16.mxu0 %v3374_v20  ;;  %2271 = vmatpush1.bf16.msra.mxu1 %v3369_v54  ;;  %v3417_v20 = vld [vmem:[#allocation10 + $0x30] sm:$0xff]  }
 0x89e   :  { %2272 = vmatprep.subr.bf16.mxu1 %v3377_v59  ;;  %v3418_v54 = vld [vmem:[#allocation10 + $0xb0] sm:$0xff]   ;;  %v3420_v59 = vld [vmem:[#allocation10 + $0xe8] sm:$0xff]  }
 0x8a1   :  { %2273 = vmatpush1.bf16.msra.mxu1 %v3375_v31  ;;  %v3423_v31 = vld [vmem:[#allocation10 + $0x60] sm:$0xff]  }
 0x8a2   :  { %2274 = vmatprep.subr.bf16.mxu1 %v3383_v21  ;;  %v3426_v21 = vld [vmem:[#allocation10 + $0xa0] sm:$0xff]  }
 0x8a5   :  { %2275 = vmatpush1.bf16.msra.mxu1 %v3381_v61  ;;  %v3425_v61 = vld [vmem:[#allocation10 + $0x20] sm:$0xff]  }
 0x8a6   :  { %2276 = vmatprep.subr.bf16.mxu1 %v3389_v24  ;;  %v3429_v24 = vld [vmem:[#allocation10 + $0x18] sm:$0xff]  }
 0x8a9   :  { %2277 = vmatpush1.bf16.msra.mxu1 %v3387_v26  ;;  %v3431_v26 = vld [vmem:[#allocation10 + $0x50] sm:$0xff]  }
 0x8aa   :  { %2278 = vmatprep.subr.bf16.mxu1 %v3395_v38  ;;  %v3433_v38 = vld [vmem:[#allocation10 + $0x10] sm:$0xff]  }
 0x8ad   :  { %2279 = vmatpush1.bf16.msra.mxu1 %v3393_v30  ;;  %v3435_v30 = vld [vmem:[#allocation10 + $0x48] sm:$0xff]  }
 0x91f   :  { %v1826_v44 = vpop.f32.mrf.mxu1 }
 0x921   :  { %v3188_v63 = vpop.f32.mrf.mxu1 }
 0x922   :  { %v3404_v63 = vld [vmem:[#allocation8 + $0x2c] ss:$16 sps:$4 sm:$0xff]  }
 0x923   :  { %v1829_v1 = vpop.f32.mrf.mxu1 }
 0x925   :  { %v3189_v36 = vpop.f32.mrf.mxu1 }
 0x926   :  { %v3402_v36 = vld [vmem:[#allocation8 + $0x28] ss:$16 sps:$4 sm:$0xff]  }
 0x953   :  { %v1870_v37 = vpop.f32.mrf.mxu0 }
 0x954   :  { %v1965_v40 = vadd.f32 %v1870_v37, %v1826_v44  ;;  %v3401_v44 = vld [vmem:[#allocation8 + $0x24] ss:$16 sps:$4 sm:$0xff]  }
 0x955   :  { %v3196_v62 = vpop.f32.mrf.mxu0  ;;  %2280 = vmatprep.subr.bf16.mxu1 %v3401_v44  ;;  %v3407_v37 = vld [vmem:[#allocation8 + $0x4] ss:$16 sps:$4 sm:$0xff]   ;;  %v3437_v44 = vld [vmem:[#allocation10 + $0x8] sm:$0xff]  }
 0x956   :  { %v3410_v62 = vld [vmem:[#allocation8 + $0xc] ss:$16 sps:$4 sm:$0xff]  }
 0x957   :  { %v1914_v39 = vpop.f32.mrf.mxu1  ;;  %v1873_v11 = vpop.f32.mrf.mxu0 }
 0x958   :  { %v1966_v46 = vadd.f32 %v1965_v40, %v1914_v39  ;;  %v1968_v43 = vadd.f32 %v1873_v11, %v1829_v1  ;;  %v3399_v1 = vld [vmem:[#allocation8 + $0x20] ss:$16 sps:$4 sm:$0xff]   ;;  %v3408_v11 = vld [vmem:[#allocation8 + $0x8] ss:$16 sps:$4 sm:$0xff]  }
 0x959   :  { %v3204_v42 = vpop.f32.mrf.mxu1  ;;  %v3197_v41 = vpop.f32.mrf.mxu0  ;;  %2281 = vmatpush1.bf16.msra.mxu1 %v3399_v1  ;;  %v3405_v39 = vld [vmem:[#allocation8] ss:$16 sps:$4 sm:$0xff]  }
 0x95a   :  { %2282 = vmatprep.subr.bf16.mxu1 %v3407_v37  ;;  %v3439_v1 = vld [vmem:[#allocation10 + $0x40] sm:$0xff]  }
 0x95b   :  { %v1917_v3 = vpop.f32.mrf.mxu1  ;;  %v1958_v47 = vpop.f32.mrf.mxu0  ;;  %v3441_v37 = vld [vmem:[#allocation10] sm:$0xff]  }
 0x95c   :  { %v1967_v45 = vadd.f32 %v1966_v46, %v1958_v47  ;;  %v1969_v52 = vadd.f32 %v1968_v43, %v1917_v3 }
 0x95d   :  { %v3205_v49 = vpop.f32.mrf.mxu1  ;;  %v3212_v51 = vpop.f32.mrf.mxu0  ;;  %2283 = vmatpush1.bf16.msra.mxu1 %v3405_v39 }
 0x95e   :  { %v1973_v56 = vadd.f32 %v3525_v53, %v1967_v45 }
 0x95f   :  { %v1961_v58 = vpop.f32.mrf.mxu0 }
 0x960   :  { %v1970_v0 = vadd.f32 %v1969_v52, %v1961_v58  ;;  %v4136_v4 = vadd.f32 %v4077_v29, %v1973_v56  ;;  %v4164_v58 = vld [vmem:[%s4210_s6] ss:$0 sm:$0xff] }
 0x961   :  { %v3213_v5 = vpop.f32.mrf.mxu0 }
 0x962   :  { %v1974_v57 = vadd.f32 %v3526_v7, %v1970_v0  ;;  %1992 = vadd.xlane.f32.xlu0 %v4136_v4  ;;  %v4171_v7 = vld [vmem:[%s4211_s7] ss:$0 sm:$0xff] }
 0x964   :  { %v4145_v9 = vadd.f32 %v4077_v29, %v1974_v57  ;;  %v3372_v29 = vld [vmem:[#allocation8 + $0xc8] ss:$16 sps:$4 sm:$0xff]  }
 0x965   :  { %2324 = vmatpush1.bf16.msra.mxu0 %v3372_v29  ;;  %v3419_v29 = vld [vmem:[#allocation10 + $0x68] sm:$0xff]  }
 0x966   :  { %2008 = vadd.xlane.f32.xlu0 %v2004_v60  ;;  %1994 = vadd.xlane.f32.xlu1 %v4145_v9 }
 0x967   :  { %2325 = vmatprep.subr.bf16.mxu0 %v3380_v17  ;;  %v3421_v17 = vld [vmem:[#allocation10 + $0x28] sm:$0xff]  }
 0x969   :  { %2326 = vmatpush1.bf16.msra.mxu0 %v3378_v32  ;;  %v3424_v32 = vld [vmem:[#allocation10 + $0xe0] sm:$0xff]  }
 0x96a   :  { %2010 = vadd.xlane.f32.xlu1 %v2005_v10  ;;  %2327 = vmatprep.subr.bf16.mxu0 %v3386_v23  ;;  %v3428_v23 = vld [vmem:[#allocation10 + $0xd8] sm:$0xff]  }
 0x96d   :  { %2328 = vmatpush1.bf16.msra.mxu0 %v3384_v22  ;;  %v3427_v22 = vld [vmem:[#allocation10 + $0x58] sm:$0xff]  }
 0x96e   :  { %2329 = vmatprep.subr.bf16.mxu0 %v3392_v25  ;;  %v3430_v25 = vld [vmem:[#allocation10 + $0x98] sm:$0xff]  }
 0x971   :  { %2330 = vmatpush1.bf16.msra.mxu0 %v3390_v35  ;;  %v3432_v35 = vld [vmem:[#allocation10 + $0xd0] sm:$0xff]  }
 0x972   :  { %2331 = vmatprep.subr.bf16.mxu0 %v3398_v27  ;;  %v3434_v27 = vld [vmem:[#allocation10 + $0x90] sm:$0xff]  }
 0x975   :  { %2332 = vmatpush1.bf16.msra.mxu0 %v3396_v33  ;;  %v3436_v33 = vld [vmem:[#allocation10 + $0xc8] sm:$0xff]  }
 0x976   :  { %2333 = vmatprep.subr.bf16.mxu0 %v3404_v63  ;;  %v3438_v63 = vld [vmem:[#allocation10 + $0x88] sm:$0xff]  }
 0x979   :  { %2334 = vmatpush1.bf16.msra.mxu0 %v3402_v36  ;;  %v3440_v36 = vld [vmem:[#allocation10 + $0xc0] sm:$0xff]  }
 0x97a   :  { %2335 = vmatprep.subr.bf16.mxu0 %v3410_v62  ;;  %v3442_v62 = vld [vmem:[#allocation10 + $0x80] sm:$0xff]  }
 0x97d   :  { %2336 = vmatpush1.bf16.msra.mxu0 %v3408_v11 }
 0x97e   :  { %3006 = vmatprep.subr.bf16.mxu0 %v3412_v12 }
 0x9eb   :  { %v1993_v40 = vpop.xlane.xlu0 %1992 }
 0x9ec   :  { %v1998_v42 = vmul.f32 0.0078125, %v1993_v40 }
 0x9ee   :  { %v4151_v14 = vsub.f32 %v4136_v4, %v1998_v42 }
 0x9ef   :  { %v2009_v41 = vpop.xlane.xlu0 %2008  ;;  %v1995_v46 = vpop.xlane.xlu1 %1994 }
 0x9f0   :  { %v2016_v3 = vmul.f32 0.0078125, %v2009_v41  ;;  %v1999_v47 = vmul.f32 0.0078125, %v1995_v46  ;;  %v2006_v48 = vmul.f32 %v4151_v14, %v4151_v14 }
 0x9f2   :  { %v2020_v43 = vadd.f32 1e-05, %v2016_v3  ;;  %v4156_v45 = vsub.f32 %v4145_v9, %v1999_v47  ;;  %2012 = vadd.xlane.f32.xlu0 %v2006_v48 }
 0x9f3   :  { %v2011_v49 = vpop.xlane.xlu1 %2010 }
 0x9f4   :  { %3515 = vrsqrt.f32 %v2020_v43  ;;  %v2017_v50 = vmul.f32 0.0078125, %v2011_v49  ;;  %v2007_v51 = vmul.f32 %v4156_v45, %v4156_v45 }
 0x9f6   :  { %v2021_v52 = vadd.f32 1e-05, %v2017_v50  ;;  %2014 = vadd.xlane.f32.xlu1 %v2007_v51 }
 0x9f8   :  { %3517 = vrsqrt.f32 %v2021_v52 }
 0xa01   :  { %v3516_v53 = vpop.eup %3515 }
 0xa02   :  { %v2028_v56 = vmul.f32 %v3516_v53, %v4133_v55 }
 0xa04   :  { %v2038_v5 = vmul.f32 %v4164_v58, %v2028_v56  ;;  %v2094_v56 = vsub.s32 1, %v3841_v6 }
 0xa05   :  { %v3518_v19 = vpop.eup %3517 }
 0xa06   :  { %v2029_v0 = vmul.f32 %v3518_v19, %v4140_v2  ;;  %v2048_v60 = vadd.f32 %v4171_v7, %v2038_v5  ;;  %v3411_v2 = vld [vmem:[#allocation10 + $0x78] sm:$0xff]   ;;  %v2102_v19 = vsub.s32 3, %v3841_v6 }
 0xa07   :  { %2978 = vmatprep.subr.bf16.mxu1 %v3411_v2 }
 0xa08   :  { %v2039_v57 = vmul.f32 %v4164_v58, %v2029_v0  ;;  %v2098_v0 = vsub.s32 2, %v3841_v6 }
 0xa0a   :  { %v2049_v55 = vadd.f32 %v4171_v7, %v2039_v57 }
 0xa0c   :  { %v2052_v10 = vpack.c.bf16 %v2049_v55, %v2048_v60 }
 0xa0e   :  { %2301 = vmatmul.mubr.bf16.vlgmr.msra.gmra.mxu1 %v2052_v10  ;;  %2354 = vmatmul.mubr.bf16.vlgmr.msra.gmra.mxu0 %v2052_v10 }
 0xa0f   :  { %2310 = vmatprep.mubr.bf16.mxu1 %v3668_v28  ;;  %2363 = vmatprep.mubr.bf16.mxu0 %v3668_v28  ;;  %v3422_v28 = vld [vmem:[#allocation10 + $0xa8] sm:$0xff]  }
 0xa10   :  { %2979 = vmatpush3.bf16.msra.mxu1 %v3413_v13  ;;  %3007 = vmatpush3.bf16.msra.mxu0 %v3414_v16 }
 0xa11   :  { %2980 = vmatprep.subr.bf16.mxu1 %v3415_v15  ;;  %3008 = vmatprep.subr.bf16.mxu0 %v3416_v18 }
 0xa14   :  { %2981 = vmatpush3.bf16.msra.mxu1 %v3417_v20  ;;  %3009 = vmatpush3.bf16.msra.mxu0 %v3418_v54 }
 0xa15   :  { %2982 = vmatprep.subr.bf16.mxu1 %v3419_v29  ;;  %3010 = vmatprep.subr.bf16.mxu0 %v3420_v59 }
 0xa18   :  { %2983 = vmatpush3.bf16.msra.mxu1 %v3421_v17  ;;  %3011 = vmatpush3.bf16.msra.mxu0 %v3422_v28 }
 0xa19   :  { %2984 = vmatprep.subr.bf16.mxu1 %v3423_v31  ;;  %3012 = vmatprep.subr.bf16.mxu0 %v3424_v32 }
 0xa1c   :  { %2985 = vmatpush3.bf16.msra.mxu1 %v3425_v61  ;;  %3013 = vmatpush3.bf16.msra.mxu0 %v3426_v21 }
 0xa1d   :  { %2986 = vmatprep.subr.bf16.mxu1 %v3427_v22  ;;  %3014 = vmatprep.subr.bf16.mxu0 %v3428_v23 }
 0xa20   :  { %2987 = vmatpush3.bf16.msra.mxu1 %v3429_v24  ;;  %3015 = vmatpush3.bf16.msra.mxu0 %v3430_v25 }
 0xa21   :  { %2988 = vmatprep.subr.bf16.mxu1 %v3431_v26  ;;  %3016 = vmatprep.subr.bf16.mxu0 %v3432_v35 }
 0xa24   :  { %2989 = vmatpush3.bf16.msra.mxu1 %v3433_v38  ;;  %3017 = vmatpush3.bf16.msra.mxu0 %v3434_v27 }
 0xa25   :  { %2990 = vmatprep.subr.bf16.mxu1 %v3435_v30  ;;  %3018 = vmatprep.subr.bf16.mxu0 %v3436_v33 }
 0xa28   :  { %2991 = vmatpush3.bf16.msra.mxu1 %v3437_v44  ;;  %3019 = vmatpush3.bf16.msra.mxu0 %v3438_v63 }
 0xa29   :  { %2992 = vmatprep.subr.bf16.mxu1 %v3439_v1  ;;  %3020 = vmatprep.subr.bf16.mxu0 %v3440_v36 }
 0xa2c   :  { %2993 = vmatpush3.bf16.msra.mxu1 %v3441_v37  ;;  %3021 = vmatpush3.bf16.msra.mxu0 %v3442_v62 }
 0xa7b   :  { %v2013_v39 = vpop.xlane.xlu0 %2012 }
 0xa7c   :  { %v2018_v11 = vmul.f32 0.0078125, %v2013_v39 }
 0xa7e   :  { %v2022_v40 = vadd.f32 1e-05, %v2018_v11 }
 0xa7f   :  { %v2015_v42 = vpop.xlane.xlu1 %2014 }
 0xa80   :  { %3519 = vrsqrt.f32 %v2022_v40  ;;  %v2019_v41 = vmul.f32 0.0078125, %v2015_v42 }
 0xa82   :  { %v2023_v46 = vadd.f32 1e-05, %v2019_v41 }
 0xa84   :  { %3521 = vrsqrt.f32 %v2023_v46 }
 0xa8d   :  { %v3520_v3 = vpop.eup %3519 }
 0xa8e   :  { %v2030_v47 = vmul.f32 %v3520_v3, %v4151_v14  ;;  %v2090_v14 = vsub.s32 0, %v3841_v6 }
 0xa90   :  { %v2040_v49 = vmul.f32 %v4164_v58, %v2030_v47 }
 0xa91   :  { %v3522_v48 = vpop.eup %3521 }
 0xa92   :  { %v2031_v43 = vmul.f32 %v3522_v48, %v4156_v45  ;;  %v2050_v51 = vadd.f32 %v4171_v7, %v2040_v49  ;;  %v2086_v45 = vld [vmem:[%s4213_s9] sm:$0xf] }
 0xa93   :  { %v2095_v57 = vrot.slane %v2086_v45, %v2094_v56  ;;  %v2103_v60 = vrot.slane %v2086_v45, %v2102_v19  ;;  %v2099_v55 = vrot.slane %v2086_v45, %v2098_v0 }
 0xa94   :  { %v2041_v50 = vmul.f32 %v4164_v58, %v2031_v43 }
 0xa96   :  { %v2051_v52 = vadd.f32 %v4171_v7, %v2041_v50  ;;  %v2091_v7 = vrot.slane %v2086_v45, %v2090_v14 }
 0xa98   :  { %v2053_v53 = vpack.c.bf16 %v2051_v52, %v2050_v51 }
 0xa9a   :  { %2311 = vmatmul.mubr.bf16.gmra.mxu1 %v2053_v53  ;;  %2364 = vmatmul.mubr.bf16.gmra.mxu0 %v2053_v53 }
 0xace   :  { %v2302_v58 = vpop.f32.mrf.mxu1  ;;  %v2355_v5 = vpop.f32.mrf.mxu0 }
 0xacf   :  { %v2303_v54 = vadd.f32 %v2302_v58, %v2091_v7  ;;  %v2356_v6 = vadd.f32 %v2355_v5, %v2099_v55 }
 0xad0   :  { %v2304_v10 = vpop.f32.mrf.mxu1  ;;  %v2357_v2 = vpop.f32.mrf.mxu0 }
 0xad1   :  { %v2305_v16 = vadd.f32 %v2304_v10, %v2095_v57  ;;  %v2358_v15 = vadd.f32 %v2357_v2, %v2103_v60  ;;  %v2374_v24 = vmax.f32 %v2303_v54, 0.0  ;;  %v2376_v25 = vmax.f32 %v2356_v6, 0.0 }
 0xad2   :  { %v2306_v12 = vpop.f32.mrf.mxu1  ;;  %v2359_v13 = vpop.f32.mrf.mxu0 }
 0xad3   :  { %v2307_v18 = vadd.f32 %v2306_v12, %v2091_v7  ;;  %v2360_v20 = vadd.f32 %v2359_v13, %v2099_v55  ;;  %v2375_v61 = vmax.f32 %v2305_v16, 0.0  ;;  %v2377_v21 = vmax.f32 %v2358_v15, 0.0 }
 0xad4   :  { %v2308_v29 = vpop.f32.mrf.mxu1  ;;  %v2361_v59 = vpop.f32.mrf.mxu0 }
 0xad5   :  { %v2309_v17 = vadd.f32 %v2308_v29, %v2095_v57  ;;  %v2362_v28 = vadd.f32 %v2361_v59, %v2103_v60  ;;  %v2378_v31 = vmax.f32 %v2307_v18, 0.0  ;;  %v2380_v32 = vmax.f32 %v2360_v20, 0.0 }
 0xad7   :  { %v2379_v22 = vmax.f32 %v2309_v17, 0.0  ;;  %v2381_v23 = vmax.f32 %v2362_v28, 0.0  ;;  %v2390_v38 = vpack.c.bf16 %v2378_v31, %v2374_v24  ;;  %v2392_v27 = vpack.c.bf16 %v2380_v32, %v2376_v25 }
 0xad9   :  { %v2391_v26 = vpack.c.bf16 %v2379_v22, %v2375_v61  ;;  %v2393_v35 = vpack.c.bf16 %v2381_v23, %v2377_v21 }
 0xadb   :  { %2693 = vmatprep.mubr.bf16.mxu1 %v2391_v26  ;;  %2742 = vmatprep.mubr.bf16.mxu0 %v2393_v35 }
 0xadc   :  { %2694 = vmatmul.mubr.bf16.vlgmr.msra.gmra.mxu1 %v2390_v38  ;;  %2743 = vmatmul.mubr.bf16.vlgmr.msra.gmra.mxu0 %v2392_v27 }
 0xb5a   :  { %v2312_v30 = vpop.f32.mrf.mxu1  ;;  %v2365_v33 = vpop.f32.mrf.mxu0 }
 0xb5b   :  { %v2313_v40 = vadd.f32 %v2312_v30, %v2091_v7  ;;  %v2366_v42 = vadd.f32 %v2365_v33, %v2099_v55 }
 0xb5c   :  { %v2314_v44 = vpop.f32.mrf.mxu1  ;;  %v2367_v63 = vpop.f32.mrf.mxu0 }
 0xb5d   :  { %v2315_v37 = vadd.f32 %v2314_v44, %v2095_v57  ;;  %v2368_v62 = vadd.f32 %v2367_v63, %v2103_v60  ;;  %v2382_v53 = vmax.f32 %v2313_v40, 0.0  ;;  %v2384_v56 = vmax.f32 %v2366_v42, 0.0 }
 0xb5e   :  { %v2316_v1 = vpop.f32.mrf.mxu1  ;;  %v2369_v36 = vpop.f32.mrf.mxu0 }
 0xb5f   :  { %v2317_v39 = vadd.f32 %v2316_v1, %v2091_v7  ;;  %v2370_v11 = vadd.f32 %v2369_v36, %v2099_v55  ;;  %v2383_v49 = vmax.f32 %v2315_v37, 0.0  ;;  %v2385_v50 = vmax.f32 %v2368_v62, 0.0 }
 0xb60   :  { %v2318_v41 = vpop.f32.mrf.mxu1  ;;  %v2371_v46 = vpop.f32.mrf.mxu0 }
 0xb61   :  { %v2319_v3 = vadd.f32 %v2318_v41, %v2095_v57  ;;  %v2372_v47 = vadd.f32 %v2371_v46, %v2103_v60  ;;  %v2386_v48 = vmax.f32 %v2317_v39, 0.0  ;;  %v2388_v43 = vmax.f32 %v2370_v11, 0.0  ;;  %v2879_v57 = vld [vmem:[%s4215_s11] ss:$0 sm:$0xff]  ;;  %s3673_s11 = smov [#allocation11]  }
 0xb62   :  { %s2772_s23 = sshll.u32 %s3673_s11, 4  ;;  %s2773_s23 = int_to_ptr.vmem [resolvable:$true] %s2772_s23 }
 0xb63   :  { %v2387_v51 = vmax.f32 %v2319_v3, 0.0  ;;  %v2389_v52 = vmax.f32 %v2372_v47, 0.0  ;;  %v2394_v0 = vpack.c.bf16 %v2386_v48, %v2382_v53  ;;  %v2396_v45 = vpack.c.bf16 %v2388_v43, %v2384_v56  ;;  %s3627_s24 = scalar_lea.vmem %s2773_s23, 512  ;;  %p3632_p12 = scmp.lt.s32.totalorder %s2773_s23, %s2773_s23 }
 0xb64   :  { %p3628_p11 = scmp.ne.s32.totalorder %s2773_s23, %s3627_s24  ;;  %p3633_p13 = scmp.lt.s32.totalorder %s3627_s24, %s3627_s24 }
 0xb65   :  { %v2395_v19 = vpack.c.bf16 %v2387_v51, %v2383_v49  ;;  %v2397_v14 = vpack.c.bf16 %v2389_v52, %v2385_v50 }
 0xb66   :  { %p3634_p0 = por %p3633_p13, %p3632_p12 }
 0xb67   :  { %2701 = vmatprep.mubr.bf16.mxu1 %v2395_v19  ;;  %2750 = vmatprep.mubr.bf16.mxu0 %v2397_v14 }
 0xb68   :  { %2702 = vmatmul.mubr.bf16.gmra.mxu1 %v2394_v0  ;;  %2751 = vmatmul.mubr.bf16.gmra.mxu0 %v2396_v45  ;;  %p3635_p1 = pnand %p3634_p0, %p3628_p11 }
 0xb9c   :  { %v2994_v58 = vpop.f32.mrf.mxu1  ;;  %v3022_v5 = vpop.f32.mrf.mxu0 }
 0xb9e   :  { %v2995_v60 = vpop.f32.mrf.mxu1  ;;  %v3023_v7 = vpop.f32.mrf.mxu0 }
 0xb9f   :  { %v2996_v55 = vadd.f32 %v2995_v60, %v2994_v58  ;;  %v3024_v13 = vadd.f32 %v3023_v7, %v3022_v5 }
 0xba0   :  { %v2997_v10 = vpop.f32.mrf.mxu1  ;;  %v3025_v2 = vpop.f32.mrf.mxu0 }
 0xba1   :  { %v2696_v12 = vadd.f32 %v2996_v55, %v2879_v57 }
 0xba2   :  { %v2998_v16 = vpop.f32.mrf.mxu1  ;;  %v3026_v15 = vpop.f32.mrf.mxu0 }
 0xba3   :  { %v2745_v18 = vadd.f32 %v3024_v13, %v2696_v12  ;;  %v2999_v20 = vadd.f32 %v2998_v16, %v2997_v10  ;;  %v3027_v29 = vadd.f32 %v3026_v15, %v3025_v2 }
 0xba5   :  { %v2759_v54 = vadd.f32 %v2745_v18, %v4081_v34  ;;  %v2699_v6 = vadd.f32 %v2999_v20, %v2879_v57 }
 0xba7   :  { %2763 = vst [vmem:[#allocation11] sm:$0xff] %v2759_v54  ;;  %v2748_v59 = vadd.f32 %v3027_v29, %v2699_v6 }
 0xba9   :  { %v2760_v17 = vadd.f32 %v2748_v59, %v4085_v8 }
 0xbab   :  { %2764 = vst [vmem:[#allocation11 + $0x8] sm:$0xff] %v2760_v17 }
 0xc28   :  { %v3000_v28 = vpop.f32.mrf.mxu1  ;;  %v3028_v31 = vpop.f32.mrf.mxu0 }
 0xc2a   :  { %v3001_v32 = vpop.f32.mrf.mxu1  ;;  %v3029_v61 = vpop.f32.mrf.mxu0 }
 0xc2b   :  { %v3002_v21 = vadd.f32 %v3001_v32, %v3000_v28  ;;  %v3030_v25 = vadd.f32 %v3029_v61, %v3028_v31 }
 0xc2c   :  { %v3003_v22 = vpop.f32.mrf.mxu1  ;;  %v3031_v23 = vpop.f32.mrf.mxu0 }
 0xc2d   :  { %v2704_v24 = vadd.f32 %v3002_v21, %v2879_v57 }
 0xc2e   :  { %v3004_v26 = vpop.f32.mrf.mxu1  ;;  %v3032_v35 = vpop.f32.mrf.mxu0 }
 0xc2f   :  { %v2753_v38 = vadd.f32 %v3030_v25, %v2704_v24  ;;  %v3005_v34 = vadd.f32 %v3004_v26, %v3003_v22  ;;  %v3033_v33 = vadd.f32 %v3032_v35, %v3031_v23 }
 0xc31   :  { %v2761_v27 = vadd.f32 %v2753_v38, %v4136_v4  ;;  %v2707_v30 = vadd.f32 %v3005_v34, %v2879_v57 }
 0xc33   :  { %2765 = vst [vmem:[#allocation11 + $0x10] sm:$0xff] %v2761_v27  ;;  %v2756_v8 = vadd.f32 %v3033_v33, %v2707_v30 }
 0xc35   :  { %v2762_v44 = vadd.f32 %v2756_v8, %v4145_v9 }
 0xc37   :  { %2766 = vst [vmem:[#allocation11 + $0x18] sm:$0xff] %v2762_v44 }
 0xc38   :  { %3638 = shalt.err (!%p3635_p1)
}
 0xc39   :  { %2778 = dma.vmem_to_hbm [thread:$0]  %s2773_s23, 512, %s4216_s12, [#allocation4], %s3662_s19, %s3662_s19, %s3663_s20  }
 0xc3a   :  { %3653 = dma.done.wait [#allocation4], 512  }
 0xc3b   :  { %3654 = vsyncadd [#allocation4], 4294966784 }
 0xc3c   :  { %2782 = vsyncpa [#allocation3], 1 }
 0xc3d   :  { %2783 = vsyncpa [#allocation6], 1 }
 0xc3e   :  { %2784 = vsyncpa [#allocation9], 1 }
 0xc3f   :  { %2785 = vsyncpa [#allocation4], 1 }

</bundles_post_ra>
